<compile_context>
chip_gen: v5e
topology: v5e:2x2
jax: 0.10.0
libtpu: 0.0.40
codegen_flags: <defaults>
</compile_context>

<pallas_src>
import math

import jax
import jax.numpy as jnp
from jax.experimental import pallas as pl
from jax.experimental.pallas import tpu as pltpu

LANE = 128


def _round_up(n, m):
    return ((n + m - 1) // m) * m


def _nbytes(a):
    return math.prod(a.shape) * jnp.dtype(a.dtype).itemsize


def _silu(x):
    return x * jax.nn.sigmoid(x)


# ----------------------------------------------------------------------------------
# Kernel
# ----------------------------------------------------------------------------------
def llm_pretraining_kernel(
    x_ref, g_ref, s_ref,
    wx0x_ref, wx0g_ref, bx0_ref, wx1_ref, bx1_ref, wx2_ref, bx2_ref,   # x_proj
    ws0_ref, bs0_ref, ws1_ref, bs1_ref, ws2_ref, bs2_ref,               # sentence_proj
    wu0x_ref, wu0s_ref, bu0_ref, wu1_ref, bu1_ref, wu2_ref, bu2_ref,    # proj_up
    out_ref,
):
    f32 = jnp.float32
    bf16 = jnp.bfloat16

    x = x_ref[...]            # (TB, im*im*T)   bf16
    g = g_ref[...]            # (TB, im*im*2)   bf16
    s = s_ref[...]            # (TB, llm_dim)   bf16

    # ---- x_proj: Linear -> SiLU -> Linear -> SiLU -> Linear ----
    # torch.cat((x, grid), -1).flatten(1,3) @ W0 computed as a split matmul
    # (weight rows pre-permuted at prep time) so the concat never hits HBM.
    h = (jnp.dot(x, wx0x_ref[...], preferred_element_type=f32)
         + jnp.dot(g, wx0g_ref[...], preferred_element_type=f32)
         + bx0_ref[...])
    h = _silu(h).astype(bf16)
    h = jnp.dot(h, wx1_ref[...], preferred_element_type=f32) + bx1_ref[...]
    h = _silu(h).astype(bf16)
    x_emb = jnp.dot(h, wx2_ref[...], preferred_element_type=f32) + bx2_ref[...]   # (TB, Hp)

    # ---- sentence_proj: Linear -> ReLU -> Linear -> ReLU -> Linear ----
    t = jnp.dot(s, ws0_ref[...], preferred_element_type=f32) + bs0_ref[...]
    t = jnp.maximum(t, 0.0).astype(bf16)
    t = jnp.dot(t, ws1_ref[...], preferred_element_type=f32) + bs1_ref[...]
    t = jnp.maximum(t, 0.0).astype(bf16)
    s_emb = jnp.dot(t, ws2_ref[...], preferred_element_type=f32) + bs2_ref[...]   # (TB, Hp)

    # ---- proj_up on cat([x_emb, s_emb], -1): split first layer (no lane concat) ----
    u = (jnp.dot(x_emb.astype(bf16), wu0x_ref[...], preferred_element_type=f32)
         + jnp.dot(s_emb.astype(bf16), wu0s_ref[...], preferred_element_type=f32)
         + bu0_ref[...])
    u = _silu(u).astype(bf16)
    u = jnp.dot(u, wu1_ref[...], preferred_element_type=f32) + bu1_ref[...]
    u = _silu(u).astype(bf16)
    out = jnp.dot(u, wu2_ref[...], preferred_element_type=f32) + bu2_ref[...]     # (TB, Np)
    out_ref[...] = out.astype(out_ref.dtype)


# ----------------------------------------------------------------------------------
# Parameter preparation: split wx0/wu0, cast weights to bf16, pad hidden dims to 128
# ----------------------------------------------------------------------------------
def prepare_params(params, im_size, T, embed_dim, weight_dtype=jnp.bfloat16):
    (wx0, bx0), (wx1, bx1), (wx2, bx2), (ws0, bs0), (ws1, bs1), (ws2, bs2), \
        (wu0, bu0), (wu1, bu1), (wu2, bu2) = params

    px = im_size * im_size
    E = embed_dim
    half = E // 2
    Ep = _round_up(E, LANE)
    Hp = _round_up(half, LANE)
    Np = _round_up(px, LANE)
    d0 = wu0.shape[1]          # 128
    d1 = wu1.shape[1]          # 256

    def padw(w, rows, cols):
        w = w.astype(weight_dtype)
        if w.shape == (rows, cols):
            return w
        return jnp.zeros((rows, cols), weight_dtype).at[:w.shape[0], :w.shape[1]].set(w)

    def padb(b, cols):
        b = b.astype(jnp.float32)
        if b.shape[1] == cols:
            return b
        return jnp.zeros((1, cols), jnp.float32).at[:, :b.shape[1]].set(b)

    # Fold torch.cat((x, grid), -1).flatten(1,3) into the first x_proj layer.
    # Flat feature index = pixel*(T+2) + channel; channels [0,T) come from x, [T,T+2) from grid.
    wx0_r = wx0.reshape(px, T + 2, E)
    wx0x = wx0_r[:, :T, :].reshape(px * T, E)
    wx0g = wx0_r[:, T:, :].reshape(px * 2, E)

    # Split proj_up's first layer into the x_emb half and the s_emb half.
    wu0x = wu0[:half, :]
    wu0s = wu0[half:2 * half, :]

    return [
        # x_proj
        padw(wx0x, px * T, Ep), padw(wx0g, px * 2, Ep), padb(bx0, Ep),
        padw(wx1, Ep, Ep), padb(bx1, Ep),
        padw(wx2, Ep, Hp), padb(bx2, Hp),
        # sentence_proj
        padw(ws0, ws0.shape[0], Ep), padb(bs0, Ep),
        padw(ws1, Ep, Ep), padb(bs1, Ep),
        padw(ws2, Ep, Hp), padb(bs2, Hp),
        # proj_up
        padw(wu0x, Hp, d0), padw(wu0s, Hp, d0), padb(bu0, d0),
        padw(wu1, d0, d1), padb(bu1, d1),
        padw(wu2, d1, Np), padb(bu2, Np),
    ]


# ----------------------------------------------------------------------------------
# Wrapper (default branch of LLMPretraining.forward: clip=False, return_embedding=False)
# ----------------------------------------------------------------------------------
def llm_pretraining_forward(x, grid_xy, sentence_emb, params, im_size,
                            initial_step, num_channels=1, embed_dim=32):
    B = x.shape[0]
    T = initial_step * num_channels
    px = im_size * im_size
    out_dim = px
    out_dim_p = _round_up(out_dim, LANE)

    flat_params = prepare_params(params, im_size, T, embed_dim)

    # Flatten image-like inputs (free metadata reshape; channels-last is already
    # pixel-major / channel-minor). The concat is folded into the split wx0 weights.
    x_flat = x.reshape(B, px * T).astype(jnp.bfloat16)
    g_flat = grid_xy.reshape(B, px * 2).astype(jnp.bfloat16)
    s_in = sentence_emb.astype(jnp.bfloat16)

    # Batch tiling: fill the MXU rows and enable double-buffered pipelining / 2-TC split.
    TB_MAX = 256
    if B > TB_MAX:
        TB = TB_MAX
        B_pad = _round_up(B, TB)
    else:
        TB = B
        B_pad = B
    if B_pad != B:
        pad = B_pad - B
        x_flat = jnp.pad(x_flat, ((0, pad), (0, 0)))
        g_flat = jnp.pad(g_flat, ((0, pad), (0, 0)))
        s_in = jnp.pad(s_in, ((0, pad), (0, 0)))
    grid_steps = B_pad // TB

    def batch_spec(cols):
        return pl.BlockSpec((TB, cols), lambda i: (i, 0))

    def const_spec(a):
        return pl.BlockSpec(a.shape, lambda i: (0, 0))

    in_specs = ([batch_spec(x_flat.shape[1]),
                 batch_spec(g_flat.shape[1]),
                 batch_spec(s_in.shape[1])]
                + [const_spec(p) for p in flat_params])
    out_spec = batch_spec(out_dim_p)

    # Cost estimate (advisory, helps XLA schedule around the custom call).
    Ep = _round_up(embed_dim, LANE)
    d0 = params[6][0].shape[1]
    d1 = params[7][0].shape[1]
    flops_per_row = 2 * sum(int(p.shape[0]) * int(p.shape[1])
                            for p in flat_params if p.shape[0] > 1)
    cost = pl.CostEstimate(
        flops=flops_per_row * B_pad,
        transcendentals=B_pad * (2 * Ep + d0 + d1),   # sigmoid evaluations (SiLU sites)
        bytes_accessed=(sum(_nbytes(p) for p in flat_params)
                        + _nbytes(x_flat) + _nbytes(g_flat) + _nbytes(s_in)
                        + B_pad * out_dim_p * 4),
    )

    # VMEM budget: resident weights + double-buffered activation tiles (+ headroom),
    # capped well below v7x's 64 MiB physical VMEM.
    param_bytes = sum(_nbytes(p) for p in flat_params)
    act_bytes = (TB * (x_flat.shape[1] + g_flat.shape[1] + s_in.shape[1]) * 2
                 + TB * out_dim_p * 4)
    vmem_need = param_bytes + 2 * act_bytes + (2 << 20)
    vmem_limit = int(min(max(vmem_need, 32 << 20), 48 << 20))

    out = pl.pallas_call(
        llm_pretraining_kernel,
        out_shape=jax.ShapeDtypeStruct((B_pad, out_dim_p), jnp.float32),
        grid=(grid_steps,),
        in_specs=in_specs,
        out_specs=out_spec,
        compiler_params=pltpu.CompilerParams(
            dimension_semantics=("parallel",),
            vmem_limit_bytes=vmem_limit,
        ),
        cost_estimate=cost,
    )(x_flat, g_flat, s_in, *flat_params)

    return out[:B, :out_dim].reshape(B, 1, im_size, im_size)


# ----------------------------------------------------------------------------------
# Init + plain-JAX reference (same precision policy: bf16 operands, f32 accumulation)
# ----------------------------------------------------------------------------------
def _linear_init(key, fan_in, fan_out):
    """PyTorch-style uniform init; weight stored (in, out), bias (1, out)."""
    kw, kb = jax.random.split(key)
    bound = 1.0 / (fan_in ** 0.5)
    w = jax.random.uniform(kw, (fan_in, fan_out), jnp.float32, -bound, bound)
    b = jax.random.uniform(kb, (1, fan_out), jnp.float32, -bound, bound)
    return w, b


def init_params(key, llm_dim, embed_dim, im_size, initial_step, num_channels=1):
    d_in = (initial_step * num_channels + 2) * im_size * im_size
    half = embed_dim // 2
    keys = jax.random.split(key, 9)
    return [
        # x_proj
        _linear_init(keys[0], d_in, embed_dim),
        _linear_init(keys[1], embed_dim, embed_dim),
        _linear_init(keys[2], embed_dim, half),
        # sentence_proj
        _linear_init(keys[3], llm_dim, embed_dim),
        _linear_init(keys[4], embed_dim, embed_dim),
        _linear_init(keys[5], embed_dim, half),
        # proj_up
        _linear_init(keys[6], 32, 128),
        _linear_init(keys[7], 128, 256),
        _linear_init(keys[8], 256, im_size * im_size),
    ]


def _reference_forward(x, grid_xy, sentence_emb, params, im_size):
    bf16, f32 = jnp.bfloat16, jnp.float32
    B = x.shape[0]
    xf = jnp.concatenate([x, grid_xy], axis=-1).reshape(B, -1).astype(bf16)
    s = sentence_emb.astype(bf16)
    (wx0, bx0), (wx1, bx1), (wx2, bx2), (ws0, bs0), (ws1, bs1), (ws2, bs2), \
        (wu0, bu0), (wu1, bu1), (wu2, bu2) = params

    def lin(a, w, b):
        return jnp.dot(a, w.astype(bf16), preferred_element_type=f32) + b

    h = _silu(lin(xf, wx0, bx0)).astype(bf16)
    h = _silu(lin(h, wx1, bx1)).astype(bf16)
    x_emb = lin(h, wx2, bx2)

    g = jnp.maximum(lin(s, ws0, bs0), 0.0).astype(bf16)
    g = jnp.maximum(lin(g, ws1, bs1), 0.0).astype(bf16)
    s_emb = lin(g, ws2, bs2)

    z = jnp.concatenate([x_emb, s_emb], axis=-1).astype(bf16)
    u = _silu(lin(z, wu0, bu0)).astype(bf16)
    u = _silu(lin(u, wu1, bu1)).astype(bf16)
    out = lin(u, wu2, bu2)
    return out.reshape(B, 1, im_size, im_size)


if __name__ == "__main__":
    B = 2
    im_size = 16
    initial_step = 4
    num_channels = 1
    embed_dim = 32
    llm_dim = 384          # e.g. all-MiniLM-style SentenceTransformer

    key = jax.random.PRNGKey(0)
    k_x, k_g, k_s, k_p = jax.random.split(key, 4)

    x = jax.random.normal(k_x, (B, im_size, im_size, initial_step * num_channels), jnp.float32)
    grid_xy = jax.random.normal(k_g, (B, im_size, im_size, 2), jnp.float32)
    # Stand-in for the SentenceTransformer's pooled output (see TODO at top of file).
    sentence_emb = jax.random.normal(k_s, (B, llm_dim), jnp.float32)

    params = init_params(k_p, llm_dim, embed_dim, im_size, initial_step, num_channels)

    out = llm_pretraining_forward(x, grid_xy, sentence_emb, params, im_size,
                                  initial_step, num_channels, embed_dim)
    out = jax.block_until_ready(out)
    assert out.shape == (B, 1, im_size, im_size)

    ref = _reference_forward(x, grid_xy, sentence_emb, params, im_size)
    if not jnp.allclose(out, ref, rtol=2e-2, atol=2e-2):
        err = float(jnp.max(jnp.abs(out - ref)))
        raise AssertionError(f"Pallas kernel diverges from JAX reference (max abs err {err})")

    print("KERNEL_OK")
</pallas_src>

<mosaic_0001>
module attributes {stable_mosaic.version = 11 : i64} {
  func.func @llm_pretraining_kernel(%arg0: i32, %arg1: memref<2x1024xbf16, #tpu.memory_space<vmem>>, %arg2: memref<2x512xbf16, #tpu.memory_space<vmem>>, %arg3: memref<2x384xbf16, #tpu.memory_space<vmem>>, %arg4: memref<1024x128xbf16, #tpu.memory_space<vmem>>, %arg5: memref<512x128xbf16, #tpu.memory_space<vmem>>, %arg6: memref<1x128xf32, #tpu.memory_space<vmem>>, %arg7: memref<128x128xbf16, #tpu.memory_space<vmem>>, %arg8: memref<1x128xf32, #tpu.memory_space<vmem>>, %arg9: memref<128x128xbf16, #tpu.memory_space<vmem>>, %arg10: memref<1x128xf32, #tpu.memory_space<vmem>>, %arg11: memref<384x128xbf16, #tpu.memory_space<vmem>>, %arg12: memref<1x128xf32, #tpu.memory_space<vmem>>, %arg13: memref<128x128xbf16, #tpu.memory_space<vmem>>, %arg14: memref<1x128xf32, #tpu.memory_space<vmem>>, %arg15: memref<128x128xbf16, #tpu.memory_space<vmem>>, %arg16: memref<1x128xf32, #tpu.memory_space<vmem>>, %arg17: memref<128x128xbf16, #tpu.memory_space<vmem>>, %arg18: memref<128x128xbf16, #tpu.memory_space<vmem>>, %arg19: memref<1x128xf32, #tpu.memory_space<vmem>>, %arg20: memref<128x256xbf16, #tpu.memory_space<vmem>>, %arg21: memref<1x256xf32, #tpu.memory_space<vmem>>, %arg22: memref<256x256xbf16, #tpu.memory_space<vmem>>, %arg23: memref<1x256xf32, #tpu.memory_space<vmem>>, %arg24: memref<2x256xf32, #tpu.memory_space<vmem>>) attributes {dimension_semantics = [#tpu.dimension_semantics<parallel>], iteration_bounds = array<i64: 1>, scalar_prefetch = 0 : i64, scratch_operands = 0 : i64, tpu.core_type = #tpu.core_type<tc>, window_params = [{transform_indices = @transform_0, window_bounds = array<i64: 2, 1024>}, {transform_indices = @transform_1, window_bounds = array<i64: 2, 512>}, {transform_indices = @transform_2, window_bounds = array<i64: 2, 384>}, {pipeline_mode = #tpu.pipeline_mode<synchronous>, transform_indices = @transform_3, window_bounds = array<i64: 1024, 128>}, {pipeline_mode = #tpu.pipeline_mode<synchronous>, transform_indices = @transform_4, window_bounds = array<i64: 512, 128>}, {pipeline_mode = #tpu.pipeline_mode<synchronous>, transform_indices = @transform_5, window_bounds = array<i64: 1, 128>}, {pipeline_mode = #tpu.pipeline_mode<synchronous>, transform_indices = @transform_6, window_bounds = array<i64: 128, 128>}, {pipeline_mode = #tpu.pipeline_mode<synchronous>, transform_indices = @transform_7, window_bounds = array<i64: 1, 128>}, {pipeline_mode = #tpu.pipeline_mode<synchronous>, transform_indices = @transform_8, window_bounds = array<i64: 128, 128>}, {pipeline_mode = #tpu.pipeline_mode<synchronous>, transform_indices = @transform_9, window_bounds = array<i64: 1, 128>}, {pipeline_mode = #tpu.pipeline_mode<synchronous>, transform_indices = @transform_10, window_bounds = array<i64: 384, 128>}, {pipeline_mode = #tpu.pipeline_mode<synchronous>, transform_indices = @transform_11, window_bounds = array<i64: 1, 128>}, {pipeline_mode = #tpu.pipeline_mode<synchronous>, transform_indices = @transform_12, window_bounds = array<i64: 128, 128>}, {pipeline_mode = #tpu.pipeline_mode<synchronous>, transform_indices = @transform_13, window_bounds = array<i64: 1, 128>}, {pipeline_mode = #tpu.pipeline_mode<synchronous>, transform_indices = @transform_14, window_bounds = array<i64: 128, 128>}, {pipeline_mode = #tpu.pipeline_mode<synchronous>, transform_indices = @transform_15, window_bounds = array<i64: 1, 128>}, {pipeline_mode = #tpu.pipeline_mode<synchronous>, transform_indices = @transform_16, window_bounds = array<i64: 128, 128>}, {pipeline_mode = #tpu.pipeline_mode<synchronous>, transform_indices = @transform_17, window_bounds = array<i64: 128, 128>}, {pipeline_mode = #tpu.pipeline_mode<synchronous>, transform_indices = @transform_18, window_bounds = array<i64: 1, 128>}, {pipeline_mode = #tpu.pipeline_mode<synchronous>, transform_indices = @transform_19, window_bounds = array<i64: 128, 256>}, {pipeline_mode = #tpu.pipeline_mode<synchronous>, transform_indices = @transform_20, window_bounds = array<i64: 1, 256>}, {pipeline_mode = #tpu.pipeline_mode<synchronous>, transform_indices = @transform_21, window_bounds = array<i64: 256, 256>}, {pipeline_mode = #tpu.pipeline_mode<synchronous>, transform_indices = @transform_22, window_bounds = array<i64: 1, 256>}, {transform_indices = @transform_23, window_bounds = array<i64: 2, 256>}]} {
    %c0 = arith.constant 0 : index
    %c0_0 = arith.constant 0 : index
    %0 = vector.load %arg1[%c0, %c0_0] : memref<2x1024xbf16, #tpu.memory_space<vmem>>, vector<2x1024xbf16>
    %c0_1 = arith.constant 0 : index
    %c0_2 = arith.constant 0 : index
    %1 = vector.load %arg2[%c0_1, %c0_2] : memref<2x512xbf16, #tpu.memory_space<vmem>>, vector<2x512xbf16>
    %c0_3 = arith.constant 0 : index
    %c0_4 = arith.constant 0 : index
    %2 = vector.load %arg3[%c0_3, %c0_4] : memref<2x384xbf16, #tpu.memory_space<vmem>>, vector<2x384xbf16>
    %c0_5 = arith.constant 0 : index
    %c0_6 = arith.constant 0 : index
    %3 = vector.load %arg4[%c0_5, %c0_6] : memref<1024x128xbf16, #tpu.memory_space<vmem>>, vector<1024x128xbf16>
    %cst = arith.constant dense<0.000000e+00> : vector<2x128xf32>
    %4 = tpu.matmul %0, %3, %cst {dimension_numbers = #tpu.dot_dimension_numbers<[1], [0], [0], [1], [0, 0, 1, 1], [], []>} : vector<2x1024xbf16>, vector<1024x128xbf16>, vector<2x128xf32> -> vector<2x128xf32>
    %c0_7 = arith.constant 0 : index
    %c0_8 = arith.constant 0 : index
    %5 = vector.load %arg5[%c0_7, %c0_8] : memref<512x128xbf16, #tpu.memory_space<vmem>>, vector<512x128xbf16>
    %cst_9 = arith.constant dense<0.000000e+00> : vector<2x128xf32>
    %6 = tpu.matmul %1, %5, %cst_9 {dimension_numbers = #tpu.dot_dimension_numbers<[1], [0], [0], [1], [0, 0, 1, 1], [], []>} : vector<2x512xbf16>, vector<512x128xbf16>, vector<2x128xf32> -> vector<2x128xf32>
    %7 = arith.addf %4, %6 : vector<2x128xf32>
    %c0_10 = arith.constant 0 : index
    %c0_11 = arith.constant 0 : index
    %8 = vector.load %arg6[%c0_10, %c0_11] : memref<1x128xf32, #tpu.memory_space<vmem>>, vector<1x128xf32>
    %9 = vector.broadcast %8 : vector<1x128xf32> to vector<2x128xf32>
    %10 = arith.addf %7, %9 : vector<2x128xf32>
    %11 = arith.negf %10 : vector<2x128xf32>
    %12 = math.exp %11 : vector<2x128xf32>
    %cst_12 = arith.constant 1.000000e+00 : f32
    %13 = vector.broadcast %cst_12 : f32 to vector<2x128xf32>
    %14 = arith.addf %13, %12 : vector<2x128xf32>
    %15 = arith.divf %13, %14 : vector<2x128xf32>
    %16 = arith.mulf %10, %15 : vector<2x128xf32>
    %17 = arith.truncf %16 : vector<2x128xf32> to vector<2x128xbf16>
    %c0_13 = arith.constant 0 : index
    %c0_14 = arith.constant 0 : index
    %18 = vector.load %arg7[%c0_13, %c0_14] : memref<128x128xbf16, #tpu.memory_space<vmem>>, vector<128x128xbf16>
    %cst_15 = arith.constant dense<0.000000e+00> : vector<2x128xf32>
    %19 = tpu.matmul %17, %18, %cst_15 {dimension_numbers = #tpu.dot_dimension_numbers<[1], [0], [0], [1], [0, 0, 1, 1], [], []>} : vector<2x128xbf16>, vector<128x128xbf16>, vector<2x128xf32> -> vector<2x128xf32>
    %c0_16 = arith.constant 0 : index
    %c0_17 = arith.constant 0 : index
    %20 = vector.load %arg8[%c0_16, %c0_17] : memref<1x128xf32, #tpu.memory_space<vmem>>, vector<1x128xf32>
    %21 = vector.broadcast %20 : vector<1x128xf32> to vector<2x128xf32>
    %22 = arith.addf %19, %21 : vector<2x128xf32>
    %23 = arith.negf %22 : vector<2x128xf32>
    %24 = math.exp %23 : vector<2x128xf32>
    %cst_18 = arith.constant 1.000000e+00 : f32
    %25 = vector.broadcast %cst_18 : f32 to vector<2x128xf32>
    %26 = arith.addf %25, %24 : vector<2x128xf32>
    %27 = arith.divf %25, %26 : vector<2x128xf32>
    %28 = arith.mulf %22, %27 : vector<2x128xf32>
    %29 = arith.truncf %28 : vector<2x128xf32> to vector<2x128xbf16>
    %c0_19 = arith.constant 0 : index
    %c0_20 = arith.constant 0 : index
    %30 = vector.load %arg9[%c0_19, %c0_20] : memref<128x128xbf16, #tpu.memory_space<vmem>>, vector<128x128xbf16>
    %cst_21 = arith.constant dense<0.000000e+00> : vector<2x128xf32>
    %31 = tpu.matmul %29, %30, %cst_21 {dimension_numbers = #tpu.dot_dimension_numbers<[1], [0], [0], [1], [0, 0, 1, 1], [], []>} : vector<2x128xbf16>, vector<128x128xbf16>, vector<2x128xf32> -> vector<2x128xf32>
    %c0_22 = arith.constant 0 : index
    %c0_23 = arith.constant 0 : index
    %32 = vector.load %arg10[%c0_22, %c0_23] : memref<1x128xf32, #tpu.memory_space<vmem>>, vector<1x128xf32>
    %33 = vector.broadcast %32 : vector<1x128xf32> to vector<2x128xf32>
    %34 = arith.addf %31, %33 : vector<2x128xf32>
    %c0_24 = arith.constant 0 : index
    %c0_25 = arith.constant 0 : index
    %35 = vector.load %arg11[%c0_24, %c0_25] : memref<384x128xbf16, #tpu.memory_space<vmem>>, vector<384x128xbf16>
    %cst_26 = arith.constant dense<0.000000e+00> : vector<2x128xf32>
    %36 = tpu.matmul %2, %35, %cst_26 {dimension_numbers = #tpu.dot_dimension_numbers<[1], [0], [0], [1], [0, 0, 1, 1], [], []>} : vector<2x384xbf16>, vector<384x128xbf16>, vector<2x128xf32> -> vector<2x128xf32>
    %c0_27 = arith.constant 0 : index
    %c0_28 = arith.constant 0 : index
    %37 = vector.load %arg12[%c0_27, %c0_28] : memref<1x128xf32, #tpu.memory_space<vmem>>, vector<1x128xf32>
    %38 = vector.broadcast %37 : vector<1x128xf32> to vector<2x128xf32>
    %39 = arith.addf %36, %38 : vector<2x128xf32>
    %cst_29 = arith.constant 0.000000e+00 : f32
    %40 = vector.broadcast %cst_29 : f32 to vector<2x128xf32>
    %41 = arith.maximumf %39, %40 : vector<2x128xf32>
    %42 = arith.truncf %41 : vector<2x128xf32> to vector<2x128xbf16>
    %c0_30 = arith.constant 0 : index
    %c0_31 = arith.constant 0 : index
    %43 = vector.load %arg13[%c0_30, %c0_31] : memref<128x128xbf16, #tpu.memory_space<vmem>>, vector<128x128xbf16>
    %cst_32 = arith.constant dense<0.000000e+00> : vector<2x128xf32>
    %44 = tpu.matmul %42, %43, %cst_32 {dimension_numbers = #tpu.dot_dimension_numbers<[1], [0], [0], [1], [0, 0, 1, 1], [], []>} : vector<2x128xbf16>, vector<128x128xbf16>, vector<2x128xf32> -> vector<2x128xf32>
    %c0_33 = arith.constant 0 : index
    %c0_34 = arith.constant 0 : index
    %45 = vector.load %arg14[%c0_33, %c0_34] : memref<1x128xf32, #tpu.memory_space<vmem>>, vector<1x128xf32>
    %46 = vector.broadcast %45 : vector<1x128xf32> to vector<2x128xf32>
    %47 = arith.addf %44, %46 : vector<2x128xf32>
    %cst_35 = arith.constant 0.000000e+00 : f32
    %48 = vector.broadcast %cst_35 : f32 to vector<2x128xf32>
    %49 = arith.maximumf %47, %48 : vector<2x128xf32>
    %50 = arith.truncf %49 : vector<2x128xf32> to vector<2x128xbf16>
    %c0_36 = arith.constant 0 : index
    %c0_37 = arith.constant 0 : index
    %51 = vector.load %arg15[%c0_36, %c0_37] : memref<128x128xbf16, #tpu.memory_space<vmem>>, vector<128x128xbf16>
    %cst_38 = arith.constant dense<0.000000e+00> : vector<2x128xf32>
    %52 = tpu.matmul %50, %51, %cst_38 {dimension_numbers = #tpu.dot_dimension_numbers<[1], [0], [0], [1], [0, 0, 1, 1], [], []>} : vector<2x128xbf16>, vector<128x128xbf16>, vector<2x128xf32> -> vector<2x128xf32>
    %c0_39 = arith.constant 0 : index
    %c0_40 = arith.constant 0 : index
    %53 = vector.load %arg16[%c0_39, %c0_40] : memref<1x128xf32, #tpu.memory_space<vmem>>, vector<1x128xf32>
    %54 = vector.broadcast %53 : vector<1x128xf32> to vector<2x128xf32>
    %55 = arith.addf %52, %54 : vector<2x128xf32>
    %56 = arith.truncf %34 : vector<2x128xf32> to vector<2x128xbf16>
    %c0_41 = arith.constant 0 : index
    %c0_42 = arith.constant 0 : index
    %57 = vector.load %arg17[%c0_41, %c0_42] : memref<128x128xbf16, #tpu.memory_space<vmem>>, vector<128x128xbf16>
    %cst_43 = arith.constant dense<0.000000e+00> : vector<2x128xf32>
    %58 = tpu.matmul %56, %57, %cst_43 {dimension_numbers = #tpu.dot_dimension_numbers<[1], [0], [0], [1], [0, 0, 1, 1], [], []>} : vector<2x128xbf16>, vector<128x128xbf16>, vector<2x128xf32> -> vector<2x128xf32>
    %59 = arith.truncf %55 : vector<2x128xf32> to vector<2x128xbf16>
    %c0_44 = arith.constant 0 : index
    %c0_45 = arith.constant 0 : index
    %60 = vector.load %arg18[%c0_44, %c0_45] : memref<128x128xbf16, #tpu.memory_space<vmem>>, vector<128x128xbf16>
    %cst_46 = arith.constant dense<0.000000e+00> : vector<2x128xf32>
    %61 = tpu.matmul %59, %60, %cst_46 {dimension_numbers = #tpu.dot_dimension_numbers<[1], [0], [0], [1], [0, 0, 1, 1], [], []>} : vector<2x128xbf16>, vector<128x128xbf16>, vector<2x128xf32> -> vector<2x128xf32>
    %62 = arith.addf %58, %61 : vector<2x128xf32>
    %c0_47 = arith.constant 0 : index
    %c0_48 = arith.constant 0 : index
    %63 = vector.load %arg19[%c0_47, %c0_48] : memref<1x128xf32, #tpu.memory_space<vmem>>, vector<1x128xf32>
    %64 = vector.broadcast %63 : vector<1x128xf32> to vector<2x128xf32>
    %65 = arith.addf %62, %64 : vector<2x128xf32>
    %66 = arith.negf %65 : vector<2x128xf32>
    %67 = math.exp %66 : vector<2x128xf32>
    %cst_49 = arith.constant 1.000000e+00 : f32
    %68 = vector.broadcast %cst_49 : f32 to vector<2x128xf32>
    %69 = arith.addf %68, %67 : vector<2x128xf32>
    %70 = arith.divf %68, %69 : vector<2x128xf32>
    %71 = arith.mulf %65, %70 : vector<2x128xf32>
    %72 = arith.truncf %71 : vector<2x128xf32> to vector<2x128xbf16>
    %c0_50 = arith.constant 0 : index
    %c0_51 = arith.constant 0 : index
    %73 = vector.load %arg20[%c0_50, %c0_51] : memref<128x256xbf16, #tpu.memory_space<vmem>>, vector<128x256xbf16>
    %cst_52 = arith.constant dense<0.000000e+00> : vector<2x256xf32>
    %74 = tpu.matmul %72, %73, %cst_52 {dimension_numbers = #tpu.dot_dimension_numbers<[1], [0], [0], [1], [0, 0, 1, 1], [], []>} : vector<2x128xbf16>, vector<128x256xbf16>, vector<2x256xf32> -> vector<2x256xf32>
    %c0_53 = arith.constant 0 : index
    %c0_54 = arith.constant 0 : index
    %75 = vector.load %arg21[%c0_53, %c0_54] : memref<1x256xf32, #tpu.memory_space<vmem>>, vector<1x256xf32>
    %76 = vector.broadcast %75 : vector<1x256xf32> to vector<2x256xf32>
    %77 = arith.addf %74, %76 : vector<2x256xf32>
    %78 = arith.negf %77 : vector<2x256xf32>
    %79 = math.exp %78 : vector<2x256xf32>
    %cst_55 = arith.constant 1.000000e+00 : f32
    %80 = vector.broadcast %cst_55 : f32 to vector<2x256xf32>
    %81 = arith.addf %80, %79 : vector<2x256xf32>
    %82 = arith.divf %80, %81 : vector<2x256xf32>
    %83 = arith.mulf %77, %82 : vector<2x256xf32>
    %84 = arith.truncf %83 : vector<2x256xf32> to vector<2x256xbf16>
    %c0_56 = arith.constant 0 : index
    %c0_57 = arith.constant 0 : index
    %85 = vector.load %arg22[%c0_56, %c0_57] : memref<256x256xbf16, #tpu.memory_space<vmem>>, vector<256x256xbf16>
    %cst_58 = arith.constant dense<0.000000e+00> : vector<2x256xf32>
    %86 = tpu.matmul %84, %85, %cst_58 {dimension_numbers = #tpu.dot_dimension_numbers<[1], [0], [0], [1], [0, 0, 1, 1], [], []>} : vector<2x256xbf16>, vector<256x256xbf16>, vector<2x256xf32> -> vector<2x256xf32>
    %c0_59 = arith.constant 0 : index
    %c0_60 = arith.constant 0 : index
    %87 = vector.load %arg23[%c0_59, %c0_60] : memref<1x256xf32, #tpu.memory_space<vmem>>, vector<1x256xf32>
    %88 = vector.broadcast %87 : vector<1x256xf32> to vector<2x256xf32>
    %89 = arith.addf %86, %88 : vector<2x256xf32>
    %c0_61 = arith.constant 0 : index
    %c0_62 = arith.constant 0 : index
    %90 = vector.load %arg24[%c0_61, %c0_62] : memref<2x256xf32, #tpu.memory_space<vmem>>, vector<2x256xf32>
    tpu.vector_store %arg24[%c0_61, %c0_62], %89 {strides = array<i32>} : memref<2x256xf32, #tpu.memory_space<vmem>>, vector<2x256xf32>,
    return
  }
  func.func @transform_0(%arg0: i32) -> (i32, i32) {
    %c0_i32 = arith.constant 0 : i32
    %c0_i32_0 = arith.constant 0 : i32
    return %arg0, %c0_i32 : i32, i32
  }
  func.func @transform_1(%arg0: i32) -> (i32, i32) {
    %c0_i32 = arith.constant 0 : i32
    %c0_i32_0 = arith.constant 0 : i32
    return %arg0, %c0_i32 : i32, i32
  }
  func.func @transform_2(%arg0: i32) -> (i32, i32) {
    %c0_i32 = arith.constant 0 : i32
    %c0_i32_0 = arith.constant 0 : i32
    return %arg0, %c0_i32 : i32, i32
  }
  func.func @transform_3(%arg0: i32) -> (i32, i32) {
    %c0_i32 = arith.constant 0 : i32
    %c0_i32_0 = arith.constant 0 : i32
    %c0_i32_1 = arith.constant 0 : i32
    return %c0_i32, %c0_i32_0 : i32, i32
  }
  func.func @transform_4(%arg0: i32) -> (i32, i32) {
    %c0_i32 = arith.constant 0 : i32
    %c0_i32_0 = arith.constant 0 : i32
    %c0_i32_1 = arith.constant 0 : i32
    return %c0_i32, %c0_i32_0 : i32, i32
  }
  func.func @transform_5(%arg0: i32) -> (i32, i32) {
    %c0_i32 = arith.constant 0 : i32
    %c0_i32_0 = arith.constant 0 : i32
    %c0_i32_1 = arith.constant 0 : i32
    return %c0_i32, %c0_i32_0 : i32, i32
  }
  func.func @transform_6(%arg0: i32) -> (i32, i32) {
    %c0_i32 = arith.constant 0 : i32
    %c0_i32_0 = arith.constant 0 : i32
    %c0_i32_1 = arith.constant 0 : i32
    return %c0_i32, %c0_i32_0 : i32, i32
  }
  func.func @transform_7(%arg0: i32) -> (i32, i32) {
    %c0_i32 = arith.constant 0 : i32
    %c0_i32_0 = arith.constant 0 : i32
    %c0_i32_1 = arith.constant 0 : i32
    return %c0_i32, %c0_i32_0 : i32, i32
  }
  func.func @transform_8(%arg0: i32) -> (i32, i32) {
    %c0_i32 = arith.constant 0 : i32
    %c0_i32_0 = arith.constant 0 : i32
    %c0_i32_1 = arith.constant 0 : i32
    return %c0_i32, %c0_i32_0 : i32, i32
  }
  func.func @transform_9(%arg0: i32) -> (i32, i32) {
    %c0_i32 = arith.constant 0 : i32
    %c0_i32_0 = arith.constant 0 : i32
    %c0_i32_1 = arith.constant 0 : i32
    return %c0_i32, %c0_i32_0 : i32, i32
  }
  func.func @transform_10(%arg0: i32) -> (i32, i32) {
    %c0_i32 = arith.constant 0 : i32
    %c0_i32_0 = arith.constant 0 : i32
    %c0_i32_1 = arith.constant 0 : i32
    return %c0_i32, %c0_i32_0 : i32, i32
  }
  func.func @transform_11(%arg0: i32) -> (i32, i32) {
    %c0_i32 = arith.constant 0 : i32
    %c0_i32_0 = arith.constant 0 : i32
    %c0_i32_1 = arith.constant 0 : i32
    return %c0_i32, %c0_i32_0 : i32, i32
  }
  func.func @transform_12(%arg0: i32) -> (i32, i32) {
    %c0_i32 = arith.constant 0 : i32
    %c0_i32_0 = arith.constant 0 : i32
    %c0_i32_1 = arith.constant 0 : i32
    return %c0_i32, %c0_i32_0 : i32, i32
  }
  func.func @transform_13(%arg0: i32) -> (i32, i32) {
    %c0_i32 = arith.constant 0 : i32
    %c0_i32_0 = arith.constant 0 : i32
    %c0_i32_1 = arith.constant 0 : i32
    return %c0_i32, %c0_i32_0 : i32, i32
  }
  func.func @transform_14(%arg0: i32) -> (i32, i32) {
    %c0_i32 = arith.constant 0 : i32
    %c0_i32_0 = arith.constant 0 : i32
    %c0_i32_1 = arith.constant 0 : i32
    return %c0_i32, %c0_i32_0 : i32, i32
  }
  func.func @transform_15(%arg0: i32) -> (i32, i32) {
    %c0_i32 = arith.constant 0 : i32
    %c0_i32_0 = arith.constant 0 : i32
    %c0_i32_1 = arith.constant 0 : i32
    return %c0_i32, %c0_i32_0 : i32, i32
  }
  func.func @transform_16(%arg0: i32) -> (i32, i32) {
    %c0_i32 = arith.constant 0 : i32
    %c0_i32_0 = arith.constant 0 : i32
    %c0_i32_1 = arith.constant 0 : i32
    return %c0_i32, %c0_i32_0 : i32, i32
  }
  func.func @transform_17(%arg0: i32) -> (i32, i32) {
    %c0_i32 = arith.constant 0 : i32
    %c0_i32_0 = arith.constant 0 : i32
    %c0_i32_1 = arith.constant 0 : i32
    return %c0_i32, %c0_i32_0 : i32, i32
  }
  func.func @transform_18(%arg0: i32) -> (i32, i32) {
    %c0_i32 = arith.constant 0 : i32
    %c0_i32_0 = arith.constant 0 : i32
    %c0_i32_1 = arith.constant 0 : i32
    return %c0_i32, %c0_i32_0 : i32, i32
  }
  func.func @transform_19(%arg0: i32) -> (i32, i32) {
    %c0_i32 = arith.constant 0 : i32
    %c0_i32_0 = arith.constant 0 : i32
    %c0_i32_1 = arith.constant 0 : i32
    return %c0_i32, %c0_i32_0 : i32, i32
  }
  func.func @transform_20(%arg0: i32) -> (i32, i32) {
    %c0_i32 = arith.constant 0 : i32
    %c0_i32_0 = arith.constant 0 : i32
    %c0_i32_1 = arith.constant 0 : i32
    return %c0_i32, %c0_i32_0 : i32, i32
  }
  func.func @transform_21(%arg0: i32) -> (i32, i32) {
    %c0_i32 = arith.constant 0 : i32
    %c0_i32_0 = arith.constant 0 : i32
    %c0_i32_1 = arith.constant 0 : i32
    return %c0_i32, %c0_i32_0 : i32, i32
  }
  func.func @transform_22(%arg0: i32) -> (i32, i32) {
    %c0_i32 = arith.constant 0 : i32
    %c0_i32_0 = arith.constant 0 : i32
    %c0_i32_1 = arith.constant 0 : i32
    return %c0_i32, %c0_i32_0 : i32, i32
  }
  func.func @transform_23(%arg0: i32) -> (i32, i32) {
    %c0_i32 = arith.constant 0 : i32
    %c0_i32_0 = arith.constant 0 : i32
    return %arg0, %c0_i32 : i32, i32
  }
}

</mosaic_0001>

<bundles_post_ra>
// kernel: tpu_custom_call.1
= control target key start
LH: loop header
LB: loop body
LE: loop exit
PB: predicated region body
PF: predicated region fallthrough
CT: control target
= control target key end

     0   :  { %s4292_s0 = inlined_call_operand.hbm [shape: bf16[2,1024], index: 0, kind: input, shape index: {}]   ;;  %s4293_s1 = inlined_call_operand.hbm [shape: bf16[2,512], index: 1, kind: input, shape index: {}]   ;;  %s4294_s2 = inlined_call_operand.hbm [shape: bf16[2,384], index: 2, kind: input, shape index: {}]   ;;  %s4295_s3 = inlined_call_operand.hbm [shape: bf16[1024,128], index: 3, kind: input, shape index: {}]   ;;  %s4296_s4 = inlined_call_operand.hbm [shape: bf16[512,128], index: 4, kind: input, shape index: {}]   ;;  %s4297_s5 = inlined_call_operand.hbm [shape: f32[1,128], index: 5, kind: input, shape index: {}]   ;;  %s4298_s6 = inlined_call_operand.hbm [shape: bf16[128,128], index: 6, kind: input, shape index: {}]   ;;  %s4299_s7 = inlined_call_operand.vmem [shape: f32[1,128], index: 7, kind: input, shape index: {}]   ;;  %s4300_s8 = inlined_call_operand.hbm [shape: bf16[128,128], index: 8, kind: input, shape index: {}]   ;;  %s4301_s9 = inlined_call_operand.vmem [shape: f32[1,128], index: 9, kind: input, shape index: {}]   ;;  %s4302_s10 = inlined_call_operand.hbm [shape: bf16[384,128], index: 10, kind: input, shape index: {}]   ;;  %s4303_s11 = inlined_call_operand.vmem [shape: f32[1,128], index: 11, kind: input, shape index: {}]   ;;  %s4304_s12 = inlined_call_operand.hbm [shape: bf16[128,128], index: 12, kind: input, shape index: {}]   ;;  %s4305_s13 = inlined_call_operand.vmem [shape: f32[1,128], index: 13, kind: input, shape index: {}]   ;;  %s4306_s14 = inlined_call_operand.hbm [shape: bf16[128,128], index: 14, kind: input, shape index: {}]   ;;  %s4307_s15 = inlined_call_operand.vmem [shape: f32[1,128], index: 15, kind: input, shape index: {}]   ;;  %s4308_s16 = inlined_call_operand.hbm [shape: bf16[128,128], index: 16, kind: input, shape index: {}]   ;;  %s4309_s17 = inlined_call_operand.hbm [shape: bf16[128,128], index: 17, kind: input, shape index: {}]   ;;  %s4310_s18 = inlined_call_operand.vmem [shape: f32[1,128], index: 18, kind: input, shape index: {}]   ;;  %s4311_s19 = inlined_call_operand.hbm [shape: bf16[128,256], index: 19, kind: input, shape index: {}]   ;;  %s4312_s20 = inlined_call_operand.vmem [shape: f32[1,256], index: 20, kind: input, shape index: {}]   ;;  %s4313_s21 = inlined_call_operand.hbm [shape: bf16[256,256], index: 21, kind: input, shape index: {}]   ;;  %s4314_s22 = inlined_call_operand.vmem [shape: f32[1,256], index: 22, kind: input, shape index: {}]   ;;  %s4315_s23 = inlined_call_operand.hbm [shape: f32[2,256], index: 23, kind: output, shape index: {}]  }
   0x1   :  { %4317 = sst [smem:[#allocation36_spill]] %s4292_s0 }
   0x2   :  { %4318 = sst [smem:[#allocation37_spill]] %s4293_s1 }
   0x3   :  { %4319 = sst [smem:[#allocation38_spill]] %s4294_s2 }
   0x4   :  { %4320 = sst [smem:[#allocation39_spill]] %s4295_s3 }
   0x5   :  { %4321 = sst [smem:[#allocation40_spill]] %s4296_s4 }
   0x6   :  { %4322 = sst [smem:[#allocation41_spill]] %s4297_s5 }
   0x7   :  { %4323 = sst [smem:[#allocation42_spill]] %s4298_s6 }
   0x8   :  { %4324 = sst [smem:[#allocation43_spill]] %s4299_s7 }
   0x9   :  { %4325 = sst [smem:[#allocation44_spill]] %s4314_s22 }
   0xa   :  { %4326 = sst [smem:[#allocation45_spill]] %s4315_s23 }
   0xb   :  { %28 = vsyncpa [#allocation3], 0 }
   0xc   :  { %29 = vsyncpa [#allocation6], 0 }
   0xd   :  { %30 = vsyncpa [#allocation9], 0 }
   0xe   :  { %31 = vsyncpa [#allocation12], 0 }
   0xf   :  { %32 = vsyncpa [#allocation15], 0 }
  0x10   :  { %33 = vsyncpa [#allocation18], 0 }
  0x11   :  { %34 = vsyncpa [#allocation21], 0 }
  0x12   :  { %35 = vsyncpa [#allocation24], 0  ;;  %s4327_s24 = sld [smem:[#allocation37_spill]] }
  0x18   :  { %s53_s25 = sshll.u32 %s4327_s24, 4  ;;  %s54_s25 = int_to_ptr.hbm [resolvable:$true] %s53_s25 }
  0x19   :  { %36 = vsyncpa [#allocation4], 0  ;;  %s4040_s5 = smov [#allocation5]   ;;  %s4328_s6 = sld [smem:[#allocation39_spill]] }
  0x1a   :  { %s55_s1 = sshll.u32 %s4040_s5, 4  ;;  %s4041_s7 = smov [#allocation8]   ;;  %s56_s1 = int_to_ptr.vmem [resolvable:$true] %s55_s1 }
  0x1b   :  { %58 = dma.hbm_to_vmem [thread:$0]  %s54_s25, 64, %s56_s1, [#allocation6]  }
  0x1c   :  { %s76_s28 = sshll.u32 %s4041_s7, 4  ;;  %s4042_s29 = smov 64   ;;  %s77_s28 = int_to_ptr.vmem [resolvable:$true] %s76_s28 }
  0x1d   :  { %s4043_s3 = smov 4   ;;  %s4329_s30 = sld [smem:[#allocation41_spill]] }
  0x1e   :  { %s4044_s5 = smov [#allocation11]   ;;  %s126_s1 = sshll.u32 %s4300_s8, 4  ;;  %s127_s1 = int_to_ptr.hbm [resolvable:$true] %s126_s1 }
  0x1f   :  { %s74_s27 = sshll.u32 %s4328_s6, 4  ;;  %s103_s23 = sshll.u32 %s4044_s5, 4  ;;  %s75_s27 = int_to_ptr.hbm [resolvable:$true] %s74_s27  ;;  %s104_s23 = int_to_ptr.vmem [resolvable:$true] %s103_s23 }
  0x20   :  { %82 = dma.hbm_to_vmem [thread:$0]  %s75_s27, 8192, %s77_s28, [#allocation9], %s4042_s29, %s4042_s29, %s4043_s3  }
  0x21   :  { %s4045_s2 = smov [#allocation14]   ;;  %s156_s27 = sshll.u32 %s4304_s12, 4  ;;  %s157_s27 = int_to_ptr.hbm [resolvable:$true] %s156_s27 }
  0x22   :  { %s128_s6 = sshll.u32 %s4045_s2, 4  ;;  %s186_s4 = sshll.u32 %s4308_s16, 4  ;;  %s129_s6 = int_to_ptr.vmem [resolvable:$true] %s128_s6  ;;  %s187_s4 = int_to_ptr.hbm [resolvable:$true] %s186_s4 }
  0x23   :  { %s101_s24 = sshll.u32 %s4329_s30, 4  ;;  %s4046_s30 = smov [#allocation17]   ;;  %s102_s24 = int_to_ptr.hbm [resolvable:$true] %s101_s24 }
  0x24   :  { %106 = dma.hbm_to_vmem [thread:$0]  %s102_s24, 16, %s104_s23, [#allocation12]  }
  0x25   :  { %134 = dma.hbm_to_vmem [thread:$0]  %s127_s1, 1024, %s129_s6, [#allocation15], %s4042_s29, %s4042_s29, %s4043_s3  }
  0x26   :  { %s158_s8 = sshll.u32 %s4046_s30, 4  ;;  %s4047_s22 = smov [#allocation20]   ;;  %s159_s8 = int_to_ptr.vmem [resolvable:$true] %s158_s8 }
  0x27   :  { %164 = dma.hbm_to_vmem [thread:$0]  %s157_s27, 1024, %s159_s8, [#allocation18], %s4042_s29, %s4042_s29, %s4043_s3  }
  0x28   :  { %s188_s12 = sshll.u32 %s4047_s22, 4  ;;  %s214_s5 = sshll.u32 %s4311_s19, 4  ;;  %s189_s12 = int_to_ptr.vmem [resolvable:$true] %s188_s12  ;;  %s215_s5 = int_to_ptr.hbm [resolvable:$true] %s214_s5 }
  0x29   :  { %194 = dma.hbm_to_vmem [thread:$0]  %s187_s4, 1024, %s189_s12, [#allocation21], %s4042_s29, %s4042_s29, %s4043_s3  }
  0x2a   :  { %s4048_s16 = smov [#allocation23]   ;;  %s4330_s2 = sld [smem:[#allocation36_spill]] }
  0x2b   :  { %s216_s26 = sshll.u32 %s4048_s16, 4  ;;  %s4316_s7 = smov 128   ;;  %s217_s26 = int_to_ptr.vmem [resolvable:$true] %s216_s26 }
  0x2c   :  { %s4050_s27 = smov 8   ;;  %s4051_s19 = smov [#allocation2]  }
  0x2d   :  { %222 = dma.hbm_to_vmem [thread:$0]  %s215_s5, 2048, %s217_s26, [#allocation24], %s4316_s7, %s4316_s7, %s4050_s27  }
  0x2e   :  { %s44_s28 = sshll.u32 %s4051_s19, 4  ;;  %s4331_s8 = sld [smem:[#allocation38_spill]]  ;;  %s45_s28 = int_to_ptr.vmem [resolvable:$true] %s44_s28 }
  0x2f   :  { %s4332_s23 = sld [smem:[#allocation40_spill]]  ;;  %s4052_s16 = smov [#allocation7]  }
  0x30   :  { %s42_s6 = sshll.u32 %s4330_s2, 4  ;;  %s66_s25 = sshll.u32 %s4052_s16, 4  ;;  %s43_s6 = int_to_ptr.hbm [resolvable:$true] %s42_s6  ;;  %s67_s25 = int_to_ptr.vmem [resolvable:$true] %s66_s25 }
  0x31   :  { %47 = dma.hbm_to_vmem [thread:$0]  %s43_s6, 128, %s45_s28, [#allocation3]  }
  0x32   :  { %s4053_s5 = smov [#allocation10]   ;;  %s4333_s19 = sld [smem:[#allocation42_spill]] }
  0x33   :  { %s89_s26 = sshll.u32 %s4053_s5, 4  ;;  %s141_s0 = sshll.u32 %s4302_s10, 4  ;;  %s90_s26 = int_to_ptr.vmem [resolvable:$true] %s89_s26  ;;  %s142_s0 = int_to_ptr.hbm [resolvable:$true] %s141_s0 }
  0x34   :  { %s64_s4 = sshll.u32 %s4331_s8, 4  ;;  %s4054_s30 = smov [#allocation13]   ;;  %s65_s4 = int_to_ptr.hbm [resolvable:$true] %s64_s4 }
  0x35   :  { %s87_s24 = sshll.u32 %s4332_s23, 4  ;;  %s113_s8 = sshll.u32 %s4054_s30, 4  ;;  %s88_s24 = int_to_ptr.hbm [resolvable:$true] %s87_s24  ;;  %s114_s8 = int_to_ptr.vmem [resolvable:$true] %s113_s8 }
  0x36   :  { %69 = dma.hbm_to_vmem [thread:$0]  %s65_s4, 48, %s67_s25, [#allocation6]  }
  0x37   :  { %95 = dma.hbm_to_vmem [thread:$0]  %s88_s24, 4096, %s90_s26, [#allocation9], %s4042_s29, %s4042_s29, %s4043_s3  }
  0x38   :  { %s111_s7 = sshll.u32 %s4333_s19, 4  ;;  %s4055_s4 = smov [#allocation16]   ;;  %s112_s7 = int_to_ptr.hbm [resolvable:$true] %s111_s7 }
  0x39   :  { %119 = dma.hbm_to_vmem [thread:$0]  %s112_s7, 1024, %s114_s8, [#allocation12], %s4042_s29, %s4042_s29, %s4043_s3  }
  0x3a   :  { %s143_s22 = sshll.u32 %s4055_s4, 4  ;;  %s171_s16 = sshll.u32 %s4306_s14, 4  ;;  %s144_s22 = int_to_ptr.vmem [resolvable:$true] %s143_s22  ;;  %s172_s16 = int_to_ptr.hbm [resolvable:$true] %s171_s16 }
  0x3b   :  { %149 = dma.hbm_to_vmem [thread:$0]  %s142_s0, 3072, %s144_s22, [#allocation15], %s4042_s29, %s4042_s29, %s4043_s3  }
  0x3c   :  { %s199_s25 = sshll.u32 %s4309_s17, 4  ;;  %s4056_s5 = smov [#allocation19]   ;;  %s200_s25 = int_to_ptr.hbm [resolvable:$true] %s199_s25 }
  0x3d   :  { %s173_s26 = sshll.u32 %s4056_s5, 4  ;;  %s4057_s7 = smov [#allocation22]   ;;  %s174_s26 = int_to_ptr.vmem [resolvable:$true] %s173_s26 }
  0x3e   :  { %179 = dma.hbm_to_vmem [thread:$0]  %s172_s16, 1024, %s174_s26, [#allocation18], %s4042_s29, %s4042_s29, %s4043_s3  }
  0x3f   :  { %s201_s14 = sshll.u32 %s4057_s7, 4  ;;  %s229_s19 = sshll.u32 %s4313_s21, 4  ;;  %s202_s14 = int_to_ptr.vmem [resolvable:$true] %s201_s14  ;;  %s230_s19 = int_to_ptr.hbm [resolvable:$true] %s229_s19 }
  0x40   :  { %207 = dma.hbm_to_vmem [thread:$0]  %s200_s25, 1024, %s202_s14, [#allocation21], %s4042_s29, %s4042_s29, %s4043_s3  }
  0x41   :  { %s4058_s17 = smov [#allocation25]   ;;  %s4334_s28 = smov 128  }
  0x42   :  { %s231_s6 = sshll.u32 %s4058_s17, 4  ;;  %s232_s6 = int_to_ptr.vmem [resolvable:$true] %s231_s6 }
  0x43   :  { %237 = dma.hbm_to_vmem [thread:$0]  %s230_s19, 4096, %s232_s6, [#allocation24], %s4334_s28, %s4334_s28, %s4050_s27  }
  0x44   :  { %4022 = dma.done.wait [#allocation3], 128  }
  0x45   :  { %4023 = vsyncadd [#allocation3], 4294967168 }
  0x46   :  { %4024 = dma.done.wait [#allocation6], 112  }
  0x47   :  { %4025 = vsyncadd [#allocation6], 4294967184 }
  0x48   :  { %4026 = dma.done.wait [#allocation9], 12288  }
  0x49   :  { %4027 = vsyncadd [#allocation9], 4294955008 }
  0x4a   :  { %4028 = dma.done.wait [#allocation12], 1040  }
  0x4b   :  { %4029 = vsyncadd [#allocation12], 4294966256 }
  0x4c   :  { %4030 = dma.done.wait [#allocation15], 4096  }
  0x4d   :  { %4031 = vsyncadd [#allocation15], 4294963200 }
  0x4e   :  { %4032 = dma.done.wait [#allocation18], 2048  }
  0x4f   :  { %4033 = vsyncadd [#allocation18], 4294965248 }
  0x50   :  { %4034 = dma.done.wait [#allocation21], 2048  }
  0x51   :  { %4035 = vsyncadd [#allocation21], 4294965248 }
  0x52   :  { %4036 = dma.done.wait [#allocation24], 6144  }
  0x53   :  { %4037 = vsyncadd [#allocation24], 4294961152  ;;  %v3446_v0 = vld [vmem:[#allocation10 + $0x38] sm:$0xff]  ;;  %v3445_v4 = vld [vmem:[#allocation10 + $0x30] sm:$0xff]  ;;  %s4335_s3 = sld [smem:[#allocation43_spill]]  ;;  %s4059_s10 = smov [#allocation26]  }
  0x54   :  { %v3454_v1 = vld [vmem:[#allocation10 + $0x78] sm:$0xff]  ;;  %697 = vmatpush.bf16.msra.mxu0 %v3446_v0  ;;  %v3453_v5 = vld [vmem:[#allocation10 + $0x70] sm:$0xff]  ;;  %v3444_v8 = vld [vmem:[#allocation10 + $0x28] sm:$0xff]  ;;  %s4336_s16 = sld [smem:[#allocation44_spill]]  ;;  %s2487_s24 = sshll.u32 %s4059_s10, 4  ;;  %s2488_s24 = int_to_ptr.vmem [resolvable:$true] %s2487_s24 }
  0x55   :  { %v3462_v2 = vld [vmem:[#allocation10 + $0xb8] sm:$0xff]  ;;  %710 = vmatpush.bf16.msra.mxu1 %v3454_v1  ;;  %v3461_v6 = vld [vmem:[#allocation10 + $0xb0] sm:$0xff]  ;;  %v3452_v9 = vld [vmem:[#allocation10 + $0x68] sm:$0xff]  ;;  %s4337_s26 = sld [smem:[#allocation45_spill]] }
  0x56   :  { %v3470_v3 = vld [vmem:[#allocation10 + $0xf8] sm:$0xff]  ;;  %723 = vmatpush.bf16.msra.mxu2 %v3462_v2  ;;  %v3469_v7 = vld [vmem:[#allocation10 + $0xf0] sm:$0xff]  ;;  %v3460_v10 = vld [vmem:[#allocation10 + $0xa8] sm:$0xff] }
  0x57   :  { %736 = vmatpush.bf16.msra.mxu3 %v3470_v3  ;;  %v3468_v11 = vld [vmem:[#allocation10 + $0xe8] sm:$0xff]  ;;  %v3443_v12 = vld [vmem:[#allocation10 + $0x20] sm:$0xff]  ;;  %v3442_v16 = vld [vmem:[#allocation10 + $0x18] sm:$0xff] }
  0x58   :  { %698 = vmatpush.bf16.msra.mxu0 %v3445_v4  ;;  %v3451_v13 = vld [vmem:[#allocation10 + $0x60] sm:$0xff]  ;;  %v3450_v17 = vld [vmem:[#allocation10 + $0x58] sm:$0xff]  ;;  %v3441_v20 = vld [vmem:[#allocation10 + $0x10] sm:$0xff] }
  0x59   :  { %711 = vmatpush.bf16.msra.mxu1 %v3453_v5  ;;  %v3459_v14 = vld [vmem:[#allocation10 + $0xa0] sm:$0xff]  ;;  %v3458_v18 = vld [vmem:[#allocation10 + $0x98] sm:$0xff]  ;;  %v3449_v21 = vld [vmem:[#allocation10 + $0x50] sm:$0xff] }
  0x5a   :  { %724 = vmatpush.bf16.msra.mxu2 %v3461_v6  ;;  %v3467_v15 = vld [vmem:[#allocation10 + $0xe0] sm:$0xff]  ;;  %v3466_v19 = vld [vmem:[#allocation10 + $0xd8] sm:$0xff]  ;;  %v3457_v23 = vld [vmem:[#allocation10 + $0x90] sm:$0xff] }
  0x5b   :  { %737 = vmatpush.bf16.msra.mxu3 %v3469_v7  ;;  %v301_v22 = vld [vmem:[#allocation5] sm:$0xf]  ;;  %v3465_v24 = vld [vmem:[#allocation10 + $0xd0] sm:$0xff]  ;;  %v3440_v25 = vld [vmem:[#allocation10 + $0x8] sm:$0xff]  ;;  %s2489_s7 = sshll.u32 %s4337_s26, 4  ;;  %s2490_s7 = int_to_ptr.hbm [resolvable:$true] %s2489_s7 }
  0x5c   :  { %699 = vmatpush.bf16.msra.mxu0 %v3444_v8  ;;  %496 = vst [vmem:[#allocation1] ss:$9 sm:$0xff] %v301_v22  ;;  %v3448_v26 = vld [vmem:[#allocation10 + $0x48] sm:$0xff]  ;;  %v300_v29 = vld [vmem:[#allocation2] sm:$0xff]  ;;  %v3439_v30 = vld [vmem:[#allocation10] sm:$0xff] }
  0x5d   :  { %712 = vmatpush.bf16.msra.mxu1 %v3452_v9  ;;  %v3456_v27 = vld [vmem:[#allocation10 + $0x88] sm:$0xff]  ;;  %v3447_v31 = vld [vmem:[#allocation10 + $0x40] sm:$0xff]  ;;  %v3382_v38 = vld [vmem:[#allocation8 + $0x38] sm:$0xff] }
  0x5e   :  { %725 = vmatpush.bf16.msra.mxu2 %v3460_v10  ;;  %v3464_v28 = vld [vmem:[#allocation10 + $0xc8] sm:$0xff]  ;;  %v3455_v36 = vld [vmem:[#allocation10 + $0x80] sm:$0xff]  ;;  %v3390_v39 = vld [vmem:[#allocation8 + $0x78] sm:$0xff] }
  0x5f   :  { %738 = vmatpush.bf16.msra.mxu3 %v3468_v11  ;;  %v3463_v37 = vld [vmem:[#allocation10 + $0xc0] sm:$0xff]  ;;  %v3398_v40 = vld [vmem:[#allocation8 + $0xb8] sm:$0xff]  ;;  %v3381_v42 = vld [vmem:[#allocation8 + $0x30] sm:$0xff] }
  0x60   :  { %700 = vmatpush.bf16.msra.mxu0 %v3443_v12  ;;  %v3406_v41 = vld [vmem:[#allocation8 + $0xf8] sm:$0xff]  ;;  %v3389_v43 = vld [vmem:[#allocation8 + $0x70] sm:$0xff]  ;;  %v3380_v46 = vld [vmem:[#allocation8 + $0x28] sm:$0xff] }
  0x61   :  { %713 = vmatpush.bf16.msra.mxu1 %v3451_v13  ;;  %v3397_v44 = vld [vmem:[#allocation8 + $0xb0] sm:$0xff]  ;;  %v3388_v47 = vld [vmem:[#allocation8 + $0x68] sm:$0xff]  ;;  %v3379_v50 = vld [vmem:[#allocation8 + $0x20] sm:$0xff] }
  0x62   :  { %726 = vmatpush.bf16.msra.mxu2 %v3459_v14  ;;  %v3405_v45 = vld [vmem:[#allocation8 + $0xf0] sm:$0xff]  ;;  %v3396_v48 = vld [vmem:[#allocation8 + $0xa8] sm:$0xff]  ;;  %v3387_v51 = vld [vmem:[#allocation8 + $0x60] sm:$0xff] }
  0x63   :  { %739 = vmatpush.bf16.msra.mxu3 %v3467_v15  ;;  %v499_v32 = vld [vmem:[#allocation1 + $0x12] sm:$0xff]  ;;  %v497_v33 = vld [vmem:[#allocation1] sm:$0xff]  ;;  %v498_v35 = vld [vmem:[#allocation1 + $0x9] sm:$0xff] }
  0x64   :  { %701 = vmatpush.bf16.msra.mxu0 %v3442_v16  ;;  %v500_v34 = vld [vmem:[#allocation1 + $0x1b] sm:$0xff]  ;;  %v3378_v54 = vld [vmem:[#allocation8 + $0x18] sm:$0xff]  ;;  %v3377_v58 = vld [vmem:[#allocation8 + $0x10] sm:$0xff] }
  0x65   :  { %714 = vmatpush.bf16.msra.mxu1 %v3450_v17  ;;  %750 = vst [vmem:[#allocation1] ss:$9 sm:$0xff] %v300_v29  ;;  %v3404_v49 = vld [vmem:[#allocation8 + $0xe8] sm:$0xff]  ;;  %v3395_v52 = vld [vmem:[#allocation8 + $0xa0] sm:$0xff]  ;;  %v3386_v55 = vld [vmem:[#allocation8 + $0x58] sm:$0xff] }
  0x66   :  { %727 = vmatpush.bf16.msra.mxu2 %v3458_v18  ;;  %v3403_v53 = vld [vmem:[#allocation8 + $0xe0] sm:$0xff]  ;;  %v3394_v56 = vld [vmem:[#allocation8 + $0x98] sm:$0xff]  ;;  %v3385_v59 = vld [vmem:[#allocation8 + $0x50] sm:$0xff] }
  0x67   :  { %740 = vmatpush.bf16.msra.mxu3 %v3466_v19  ;;  %v3402_v57 = vld [vmem:[#allocation8 + $0xd8] sm:$0xff]  ;;  %v3393_v60 = vld [vmem:[#allocation8 + $0x90] sm:$0xff]  ;;  %v3376_v62 = vld [vmem:[#allocation8 + $0x8] sm:$0xff] }
  0x68   :  { %702 = vmatpush.bf16.msra.mxu0 %v3441_v20  ;;  %v3401_v61 = vld [vmem:[#allocation8 + $0xd0] sm:$0xff]  ;;  %v3384_v63 = vld [vmem:[#allocation8 + $0x48] sm:$0xff]  ;;  %v3375_v2 = vld [vmem:[#allocation8] sm:$0xff] }
  0x69   :  { %715 = vmatpush.bf16.msra.mxu1 %v3449_v21  ;;  %v3392_v0 = vld [vmem:[#allocation8 + $0x88] sm:$0xff]  ;;  %v3383_v3 = vld [vmem:[#allocation8 + $0x40] sm:$0xff]  ;;  %v3414_v6 = vld [vmem:[#allocation8 + $0x138] sm:$0xff] }
  0x6a   :  { %728 = vmatpush.bf16.msra.mxu2 %v3457_v23  ;;  %v3400_v1 = vld [vmem:[#allocation8 + $0xc8] sm:$0xff]  ;;  %v3391_v4 = vld [vmem:[#allocation8 + $0x80] sm:$0xff]  ;;  %v3422_v7 = vld [vmem:[#allocation8 + $0x178] sm:$0xff] }
  0x6b   :  { %741 = vmatpush.bf16.msra.mxu3 %v3465_v24  ;;  %v3399_v5 = vld [vmem:[#allocation8 + $0xc0] sm:$0xff]  ;;  %v3430_v8 = vld [vmem:[#allocation8 + $0x1b8] sm:$0xff]  ;;  %v3413_v10 = vld [vmem:[#allocation8 + $0x130] sm:$0xff] }
  0x6c   :  { %703 = vmatpush.bf16.msra.mxu0 %v3440_v25  ;;  %v3438_v9 = vld [vmem:[#allocation8 + $0x1f8] sm:$0xff]  ;;  %v751_v12 = vld [vmem:[#allocation1] sm:$0xff]  ;;  %v3421_v13 = vld [vmem:[#allocation8 + $0x170] sm:$0xff] }
  0x6d   :  { %716 = vmatpush.bf16.msra.mxu1 %v3448_v26  ;;  %v753_v11 = vld [vmem:[#allocation1 + $0x12] sm:$0xff]  ;;  %v754_v14 = vld [vmem:[#allocation1 + $0x1b] sm:$0xff]  ;;  %v752_v15 = vld [vmem:[#allocation1 + $0x9] sm:$0xff] }
  0x6e   :  { %729 = vmatpush.bf16.msra.mxu2 %v3456_v27  ;;  %v3429_v16 = vld [vmem:[#allocation8 + $0x1b0] sm:$0xff]  ;;  %v3412_v18 = vld [vmem:[#allocation8 + $0x128] sm:$0xff]  ;;  %v3411_v22 = vld [vmem:[#allocation8 + $0x120] sm:$0xff] }
  0x6f   :  { %742 = vmatpush.bf16.msra.mxu3 %v3464_v28  ;;  %v3437_v17 = vld [vmem:[#allocation8 + $0x1f0] sm:$0xff]  ;;  %v3420_v19 = vld [vmem:[#allocation8 + $0x168] sm:$0xff]  ;;  %v3419_v23 = vld [vmem:[#allocation8 + $0x160] sm:$0xff] }
  0x70   :  { %704 = vmatpush.bf16.msra.mxu0 %v3439_v30  ;;  %v3428_v20 = vld [vmem:[#allocation8 + $0x1a8] sm:$0xff]  ;;  %v3427_v24 = vld [vmem:[#allocation8 + $0x1a0] sm:$0xff]  ;;  %v3410_v26 = vld [vmem:[#allocation8 + $0x118] sm:$0xff] }
  0x71   :  { %717 = vmatpush.bf16.msra.mxu1 %v3447_v31  ;;  %v3436_v21 = vld [vmem:[#allocation8 + $0x1e8] sm:$0xff]  ;;  %v3435_v25 = vld [vmem:[#allocation8 + $0x1e0] sm:$0xff]  ;;  %v3418_v27 = vld [vmem:[#allocation8 + $0x158] sm:$0xff] }
  0x72   :  { %730 = vmatpush.bf16.msra.mxu2 %v3455_v36  ;;  %v3426_v28 = vld [vmem:[#allocation8 + $0x198] sm:$0xff]  ;;  %v3409_v30 = vld [vmem:[#allocation8 + $0x110] sm:$0xff]  ;;  %v3424_v36 = vld [vmem:[#allocation8 + $0x188] sm:$0xff] }
  0x73   :  { %743 = vmatpush.bf16.msra.mxu3 %v3463_v37  ;;  %705 = vmatmul.bf16.vlgmr.msra.gmra.mxu0 %v497_v33  ;;  %v3434_v29 = vld [vmem:[#allocation8 + $0x1d8] sm:$0xff]  ;;  %v3417_v31 = vld [vmem:[#allocation8 + $0x150] sm:$0xff]  ;;  %v3432_v37 = vld [vmem:[#allocation8 + $0x1c8] sm:$0xff] }
  0x74   :  { %1151 = vmatpush.bf16.msrb.mxu0 %v3382_v38  ;;  %718 = vmatmul.bf16.vlgmr.msra.gmra.mxu1 %v498_v35  ;;  %v3433_v33 = vld [vmem:[#allocation8 + $0x1d0] sm:$0xff]  ;;  %v3416_v35 = vld [vmem:[#allocation8 + $0x148] sm:$0xff]  ;;  %v3407_v38 = vld [vmem:[#allocation8 + $0x100] sm:$0xff] }
  0x75   :  { %1164 = vmatpush.bf16.msrb.mxu1 %v3390_v39  ;;  %731 = vmatmul.bf16.vlgmr.msra.gmra.mxu2 %v499_v32  ;;  %v3425_v32 = vld [vmem:[#allocation8 + $0x190] sm:$0xff]  ;;  %v3415_v39 = vld [vmem:[#allocation8 + $0x140] sm:$0xff] }
  0x76   :  { %1177 = vmatpush.bf16.msrb.mxu2 %v3398_v40  ;;  %744 = vmatmul.bf16.vlgmr.msra.gmra.mxu3 %v500_v34  ;;  %v3408_v34 = vld [vmem:[#allocation8 + $0x108] sm:$0xff]  ;;  %v3423_v40 = vld [vmem:[#allocation8 + $0x180] sm:$0xff] }
  0x77   :  { %1190 = vmatpush.bf16.msrb.mxu3 %v3406_v41  ;;  %v3431_v41 = vld [vmem:[#allocation8 + $0x1c0] sm:$0xff] }
  0x78   :  { %1152 = vmatpush.bf16.msrb.mxu0 %v3381_v42  ;;  %v755_v42 = vld [vmem:[#allocation1 + $0x24] sm:$0xff] }
  0x79   :  { %1165 = vmatpush.bf16.msrb.mxu1 %v3389_v43  ;;  %v756_v43 = vld [vmem:[#allocation1 + $0x2d] sm:$0xff] }
  0x7a   :  { %1178 = vmatpush.bf16.msrb.mxu2 %v3397_v44  ;;  %v757_v44 = vld [vmem:[#allocation1 + $0x36] sm:$0xff] }
  0x7b   :  { %1191 = vmatpush.bf16.msrb.mxu3 %v3405_v45  ;;  %v758_v45 = vld [vmem:[#allocation1 + $0x3f] sm:$0xff] }
  0x7c   :  { %1153 = vmatpush.bf16.msrb.mxu0 %v3380_v46 }
  0x7d   :  { %1166 = vmatpush.bf16.msrb.mxu1 %v3388_v47 }
  0x7e   :  { %1179 = vmatpush.bf16.msrb.mxu2 %v3396_v48 }
  0x7f   :  { %1192 = vmatpush.bf16.msrb.mxu3 %v3404_v49 }
  0x80   :  { %1154 = vmatpush.bf16.msrb.mxu0 %v3379_v50 }
  0x81   :  { %1167 = vmatpush.bf16.msrb.mxu1 %v3387_v51 }
  0x82   :  { %1180 = vmatpush.bf16.msrb.mxu2 %v3395_v52 }
  0x83   :  { %1193 = vmatpush.bf16.msrb.mxu3 %v3403_v53 }
  0x84   :  { %1155 = vmatpush.bf16.msrb.mxu0 %v3378_v54 }
  0x85   :  { %1168 = vmatpush.bf16.msrb.mxu1 %v3386_v55 }
  0x86   :  { %1181 = vmatpush.bf16.msrb.mxu2 %v3394_v56 }
  0x87   :  { %1194 = vmatpush.bf16.msrb.mxu3 %v3402_v57 }
  0x88   :  { %1156 = vmatpush.bf16.msrb.mxu0 %v3377_v58 }
  0x89   :  { %1169 = vmatpush.bf16.msrb.mxu1 %v3385_v59 }
  0x8a   :  { %1182 = vmatpush.bf16.msrb.mxu2 %v3393_v60 }
  0x8b   :  { %1195 = vmatpush.bf16.msrb.mxu3 %v3401_v61 }
  0x8c   :  { %1157 = vmatpush.bf16.msrb.mxu0 %v3376_v62  ;;  %v3478_v62 = vld [vmem:[#allocation13 + $0x38] sm:$0xff] }
  0x8d   :  { %1170 = vmatpush.bf16.msrb.mxu1 %v3384_v63 }
  0x8e   :  { %1183 = vmatpush.bf16.msrb.mxu2 %v3392_v0 }
  0x8f   :  { %1196 = vmatpush.bf16.msrb.mxu3 %v3400_v1  ;;  %v3477_v1 = vld [vmem:[#allocation13 + $0x30] sm:$0xff] }
  0x90   :  { %1158 = vmatpush.bf16.msrb.mxu0 %v3375_v2 }
  0x91   :  { %1171 = vmatpush.bf16.msrb.mxu1 %v3383_v3 }
  0x92   :  { %1184 = vmatpush.bf16.msrb.mxu2 %v3391_v4  ;;  %v3476_v4 = vld [vmem:[#allocation13 + $0x28] sm:$0xff] }
  0x93   :  { %1197 = vmatpush.bf16.msrb.mxu3 %v3399_v5  ;;  %1159 = vmatmul.bf16.vlgmr.msrb.gmra.mxu0 %v751_v12  ;;  %v3473_v12 = vld [vmem:[#allocation13 + $0x10] sm:$0xff] }
  0x94   :  { %1203 = vmatpush.bf16.msra.mxu0 %v3414_v6  ;;  %1172 = vmatmul.bf16.vlgmr.msrb.gmra.mxu1 %v752_v15  ;;  %v3475_v6 = vld [vmem:[#allocation13 + $0x20] sm:$0xff] }
  0x95   :  { %1216 = vmatpush.bf16.msra.mxu1 %v3422_v7  ;;  %1185 = vmatmul.bf16.vlgmr.msrb.gmra.mxu2 %v753_v11 }
  0x96   :  { %1229 = vmatpush.bf16.msra.mxu2 %v3430_v8  ;;  %1198 = vmatmul.bf16.vlgmr.msrb.gmra.mxu3 %v754_v14  ;;  %v3474_v8 = vld [vmem:[#allocation13 + $0x18] sm:$0xff]  ;;  %v3472_v14 = vld [vmem:[#allocation13 + $0x8] sm:$0xff] }
  0x97   :  { %1242 = vmatpush.bf16.msra.mxu3 %v3438_v9 }
  0x98   :  { %1204 = vmatpush.bf16.msra.mxu0 %v3413_v10 }
  0x99   :  { %1217 = vmatpush.bf16.msra.mxu1 %v3421_v13 }
  0x9a   :  { %1230 = vmatpush.bf16.msra.mxu2 %v3429_v16 }
  0x9b   :  { %1243 = vmatpush.bf16.msra.mxu3 %v3437_v17 }
  0x9c   :  { %1205 = vmatpush.bf16.msra.mxu0 %v3412_v18  ;;  %v3494_v18 = vld [vmem:[#allocation16 + $0x38] sm:$0xff] }
  0x9d   :  { %1218 = vmatpush.bf16.msra.mxu1 %v3420_v19 }
  0x9e   :  { %1231 = vmatpush.bf16.msra.mxu2 %v3428_v20  ;;  %v3611_v20 = vld [vmem:[#allocation11] ss:$0 sm:$0xff] }
  0x9f   :  { %1244 = vmatpush.bf16.msra.mxu3 %v3436_v21 }
  0xa0   :  { %1206 = vmatpush.bf16.msra.mxu0 %v3411_v22 }
  0xa1   :  { %1219 = vmatpush.bf16.msra.mxu1 %v3419_v23  ;;  %v3471_v23 = vld [vmem:[#allocation13] sm:$0xff] }
  0xa2   :  { %1232 = vmatpush.bf16.msra.mxu2 %v3427_v24  ;;  %v3502_v24 = vld [vmem:[#allocation16 + $0x78] sm:$0xff] }
  0xa3   :  { %1245 = vmatpush.bf16.msra.mxu3 %v3435_v25 }
  0xa4   :  { %1207 = vmatpush.bf16.msra.mxu0 %v3410_v26  ;;  %v3493_v26 = vld [vmem:[#allocation16 + $0x30] sm:$0xff] }
  0xa5   :  { %1220 = vmatpush.bf16.msra.mxu1 %v3418_v27 }
  0xa6   :  { %1233 = vmatpush.bf16.msra.mxu2 %v3426_v28  ;;  %v3501_v28 = vld [vmem:[#allocation16 + $0x70] sm:$0xff] }
  0xa7   :  { %1246 = vmatpush.bf16.msra.mxu3 %v3434_v29 }
  0xa8   :  { %1208 = vmatpush.bf16.msra.mxu0 %v3409_v30  ;;  %v3492_v30 = vld [vmem:[#allocation16 + $0x28] sm:$0xff] }
  0xa9   :  { %1221 = vmatpush.bf16.msra.mxu1 %v3417_v31  ;;  %v3510_v31 = vld [vmem:[#allocation16 + $0xb8] sm:$0xff] }
  0xaa   :  { %1234 = vmatpush.bf16.msra.mxu2 %v3425_v32 }
  0xab   :  { %1247 = vmatpush.bf16.msra.mxu3 %v3433_v33 }
  0xac   :  { %1209 = vmatpush.bf16.msra.mxu0 %v3408_v34  ;;  %v3500_v34 = vld [vmem:[#allocation16 + $0x68] sm:$0xff] }
  0xad   :  { %1222 = vmatpush.bf16.msra.mxu1 %v3416_v35  ;;  %v3509_v35 = vld [vmem:[#allocation16 + $0xb0] sm:$0xff] }
  0xae   :  { %1235 = vmatpush.bf16.msra.mxu2 %v3424_v36  ;;  %v3491_v36 = vld [vmem:[#allocation16 + $0x20] sm:$0xff] }
  0xaf   :  { %1248 = vmatpush.bf16.msra.mxu3 %v3432_v37  ;;  %v3499_v37 = vld [vmem:[#allocation16 + $0x60] sm:$0xff] }
  0xb0   :  { %1210 = vmatpush.bf16.msra.mxu0 %v3407_v38  ;;  %v3508_v38 = vld [vmem:[#allocation16 + $0xa8] sm:$0xff] }
  0xb1   :  { %1223 = vmatpush.bf16.msra.mxu1 %v3415_v39  ;;  %v302_v39 = vld [vmem:[#allocation7] sm:$0x7] }
  0xb2   :  { %1236 = vmatpush.bf16.msra.mxu2 %v3423_v40  ;;  %v3490_v40 = vld [vmem:[#allocation16 + $0x18] sm:$0xff]  ;;  %1517 = vst [vmem:[#allocation1] ss:$9 sm:$0xff] %v302_v39  ;;  %v3525_v39 = vld [vmem:[#allocation19 + $0x30] sm:$0xff] }
  0xb3   :  { %1249 = vmatpush.bf16.msra.mxu3 %v3431_v41  ;;  %1211 = vmatmul.bf16.vlgmr.msra.gmra.mxu0 %v755_v42 }
  0xb4   :  { %1224 = vmatmul.bf16.vlgmr.msra.gmra.mxu1 %v756_v43  ;;  %1349 = vmatpush.bf16.msrb.mxu0 %v3478_v62  ;;  %v3498_v43 = vld [vmem:[#allocation16 + $0x58] sm:$0xff] }
  0xb5   :  { %1237 = vmatmul.bf16.vlgmr.msra.gmra.mxu2 %v757_v44  ;;  %v3507_v44 = vld [vmem:[#allocation16 + $0xa0] sm:$0xff] }
  0xb6   :  { %1250 = vmatmul.bf16.vlgmr.msra.gmra.mxu3 %v758_v45  ;;  %1668 = vmatpush.bf16.msrb.mxu2 %v3494_v18  ;;  %v3489_v45 = vld [vmem:[#allocation16 + $0x10] sm:$0xff]  ;;  %v3515_v18 = vld [vmem:[#allocation17 + $0x20] sm:$0xff] }
  0xb7   :  { %1681 = vmatpush.bf16.msrb.mxu3 %v3502_v24 }
  0xb8   :  { %1350 = vmatpush.bf16.msrb.mxu0 %v3477_v1 }
  0xb9   :  { %v1518_v62 = vld [vmem:[#allocation1] sm:$0xff] }
  0xba   :  { %1669 = vmatpush.bf16.msrb.mxu2 %v3493_v26 }
  0xbb   :  { %1682 = vmatpush.bf16.msrb.mxu3 %v3501_v28  ;;  %v3512_v28 = vld [vmem:[#allocation17 + $0x8] sm:$0xff] }
  0xbc   :  { %1351 = vmatpush.bf16.msrb.mxu0 %v3476_v4  ;;  %v3503_v4 = vld [vmem:[#allocation16 + $0x80] sm:$0xff] }
  0xbe   :  { %1670 = vmatpush.bf16.msrb.mxu2 %v3492_v30 }
  0xbf   :  { %1683 = vmatpush.bf16.msrb.mxu3 %v3500_v34  ;;  %v3534_v34 = vld [vmem:[#allocation20 + $0x38] sm:$0xff] }
  0xc0   :  { %1352 = vmatpush.bf16.msrb.mxu0 %v3475_v6 }
  0xc2   :  { %1671 = vmatpush.bf16.msrb.mxu2 %v3491_v36  ;;  %v3526_v36 = vld [vmem:[#allocation19 + $0x38] sm:$0xff] }
  0xc3   :  { %1684 = vmatpush.bf16.msrb.mxu3 %v3499_v37 }
  0xc4   :  { %1353 = vmatpush.bf16.msrb.mxu0 %v3474_v8  ;;  %v1520_v8 = vld [vmem:[#allocation1 + $0x12] sm:$0xff] }
  0xc6   :  { %1672 = vmatpush.bf16.msrb.mxu2 %v3490_v40 }
  0xc7   :  { %1685 = vmatpush.bf16.msrb.mxu3 %v3498_v43 }
  0xc8   :  { %1354 = vmatpush.bf16.msrb.mxu0 %v3473_v12  ;;  %v3480_v12 = vld [vmem:[#allocation14 + $0x8] sm:$0xff] }
  0xca   :  { %1673 = vmatpush.bf16.msrb.mxu2 %v3489_v45  ;;  %v3532_v45 = vld [vmem:[#allocation20 + $0x28] sm:$0xff] }
  0xcc   :  { %1355 = vmatpush.bf16.msrb.mxu0 %v3472_v14  ;;  %v3518_v14 = vld [vmem:[#allocation17 + $0x38] sm:$0xff] }
  0xd0   :  { %1356 = vmatpush.bf16.msrb.mxu0 %v3471_v23  ;;  %v3514_v23 = vld [vmem:[#allocation17 + $0x18] sm:$0xff] }
  0xd4   :  { %1694 = vmatpush.bf16.msra.mxu0 %v3510_v31 }
  0xd8   :  { %1695 = vmatpush.bf16.msra.mxu0 %v3509_v35 }
  0xdc   :  { %1696 = vmatpush.bf16.msra.mxu0 %v3508_v38  ;;  %v3533_v38 = vld [vmem:[#allocation20 + $0x30] sm:$0xff] }
  0xe0   :  { %1697 = vmatpush.bf16.msra.mxu0 %v3507_v44 }
  0xf0   :  { %v706_v46 = vpop.f32.mrf.mxu0 }
  0xf1   :  { %v719_v47 = vpop.f32.mrf.mxu1 }
  0xf2   :  { %v720_v56 = vadd.f32 %v719_v47, %v706_v46  ;;  %v3497_v46 = vld [vmem:[#allocation16 + $0x50] sm:$0xff]  ;;  %v3506_v47 = vld [vmem:[#allocation16 + $0x98] sm:$0xff] }
  0xf3   :  { %1686 = vmatpush.bf16.msrb.mxu3 %v3497_v46  ;;  %1698 = vmatpush.bf16.msra.mxu0 %v3506_v47  ;;  %v3613_v47 = vld [vmem:[%s4303_s11] ss:$0 sm:$0xff] }
  0xf8   :  { %v732_v48 = vpop.f32.mrf.mxu2  ;;  %v708_v50 = vpop.f32.mrf.mxu0 }
  0xf9   :  { %v745_v49 = vpop.f32.mrf.mxu3  ;;  %v721_v51 = vpop.f32.mrf.mxu1  ;;  %v733_v60 = vadd.f32 %v732_v48, %v720_v56  ;;  %v3488_v48 = vld [vmem:[#allocation16 + $0x8] sm:$0xff] }
  0xfa   :  { %v3496_v51 = vld [vmem:[#allocation16 + $0x48] sm:$0xff]  ;;  %1674 = vmatpush.bf16.msrb.mxu2 %v3488_v48 }
  0xfb   :  { %v746_v63 = vadd.f32 %v745_v49, %v733_v60  ;;  %v3486_v49 = vld [vmem:[#allocation14 + $0x38] sm:$0xff]  ;;  %1687 = vmatpush.bf16.msrb.mxu3 %v3496_v51 }
  0xfc   :  { %1451 = vmatpush.bf16.msrb.mxu1 %v3486_v49 }
 0x100   :  { %v734_v52 = vpop.f32.mrf.mxu2 }
 0x101   :  { %v747_v53 = vpop.f32.mrf.mxu3 }
 0x102   :  { %v3505_v53 = vld [vmem:[#allocation16 + $0x90] sm:$0xff] }
 0x103   :  { %1699 = vmatpush.bf16.msra.mxu0 %v3505_v53 }
 0x110   :  { %v1160_v54 = vpop.f32.mrf.mxu0 }
 0x111   :  { %v1173_v55 = vpop.f32.mrf.mxu1  ;;  %v1161_v3 = vadd.f32 %v1160_v54, %v746_v63  ;;  %v3485_v54 = vld [vmem:[#allocation14 + $0x30] sm:$0xff]  ;;  %v3484_v63 = vld [vmem:[#allocation14 + $0x28] sm:$0xff] }
 0x112   :  { %1452 = vmatpush.bf16.msrb.mxu1 %v3485_v54 }
 0x113   :  { %v1174_v5 = vadd.f32 %v1173_v55, %v1161_v3  ;;  %v3487_v55 = vld [vmem:[#allocation16] sm:$0xff] }
 0x114   :  { %1675 = vmatpush.bf16.msrb.mxu2 %v3487_v55  ;;  %v3530_v55 = vld [vmem:[#allocation20 + $0x18] sm:$0xff] }
 0x116   :  { %1453 = vmatpush.bf16.msrb.mxu1 %v3484_v63  ;;  %v3527_v63 = vld [vmem:[#allocation20] sm:$0xff] }
 0x117   :  { %1676 = vmatmul.bf16.vlgmr.msrb.gmra.mxu2 %v1518_v62  ;;  %v3524_v62 = vld [vmem:[#allocation19 + $0x28] sm:$0xff] }
 0x118   :  { %v1186_v57 = vpop.f32.mrf.mxu2  ;;  %v1162_v59 = vpop.f32.mrf.mxu0  ;;  %1860 = vmatpush.bf16.msra.mxu2 %v3526_v36 }
 0x119   :  { %v1199_v58 = vpop.f32.mrf.mxu3  ;;  %v1175_v61 = vpop.f32.mrf.mxu1  ;;  %v1187_v7 = vadd.f32 %v1186_v57, %v1174_v5 }
 0x11a   :  { %v3504_v61 = vld [vmem:[#allocation16 + $0x88] sm:$0xff] }
 0x11b   :  { %v1200_v9 = vadd.f32 %v1199_v58, %v1187_v7  ;;  %v3495_v58 = vld [vmem:[#allocation16 + $0x40] sm:$0xff]  ;;  %1700 = vmatpush.bf16.msra.mxu0 %v3504_v61 }
 0x11c   :  { %1688 = vmatpush.bf16.msrb.mxu3 %v3495_v58  ;;  %1861 = vmatpush.bf16.msra.mxu2 %v3525_v39  ;;  %v3555_v39 = vld [vmem:[#allocation23 + $0x64] sm:$0xf] }
 0x11f   :  { %1701 = vmatpush.bf16.msra.mxu0 %v3503_v4  ;;  %v3519_v4 = vld [vmem:[#allocation19] sm:$0xff] }
 0x120   :  { %v1188_v0 = vpop.f32.mrf.mxu2  ;;  %1862 = vmatpush.bf16.msra.mxu2 %v3524_v62  ;;  %v3548_v62 = vld [vmem:[#allocation23 + $0x24] sm:$0xf0] }
 0x121   :  { %v1201_v2 = vpop.f32.mrf.mxu3 }
 0x122   :  { %v1519_v2 = vld [vmem:[#allocation1 + $0x9] sm:$0xff] }
 0x123   :  { %1689 = vmatmul.bf16.vlgmr.msrb.gmra.mxu3 %v1519_v2  ;;  %v3521_v2 = vld [vmem:[#allocation19 + $0x10] sm:$0xff] }
 0x130   :  { %v1212_v10 = vpop.f32.mrf.mxu0 }
 0x131   :  { %v1225_v11 = vpop.f32.mrf.mxu1  ;;  %v1213_v13 = vadd.f32 %v1212_v10, %v1200_v9  ;;  %v3483_v9 = vld [vmem:[#allocation14 + $0x20] sm:$0xff]  ;;  %v3482_v10 = vld [vmem:[#allocation14 + $0x18] sm:$0xff] }
 0x132   :  { %1454 = vmatpush.bf16.msrb.mxu1 %v3483_v9 }
 0x133   :  { %v1226_v15 = vadd.f32 %v1225_v11, %v1213_v13  ;;  %v3481_v11 = vld [vmem:[#allocation14 + $0x10] sm:$0xff]  ;;  %v3479_v13 = vld [vmem:[#allocation14] sm:$0xff] }
 0x136   :  { %1455 = vmatpush.bf16.msrb.mxu1 %v3482_v10 }
 0x138   :  { %v1238_v16 = vpop.f32.mrf.mxu2  ;;  %v1214_v21 = vpop.f32.mrf.mxu0 }
 0x139   :  { %v1251_v17 = vpop.f32.mrf.mxu3  ;;  %v1239_v19 = vadd.f32 %v1238_v16, %v1226_v15  ;;  %v1227_v22 = vpop.f32.mrf.mxu1  ;;  %v3517_v15 = vld [vmem:[#allocation17 + $0x30] sm:$0xff]  ;;  %v3516_v16 = vld [vmem:[#allocation17 + $0x28] sm:$0xff] }
 0x13a   :  { %1456 = vmatpush.bf16.msrb.mxu1 %v3481_v11  ;;  %v3615_v11 = vld [vmem:[%s4305_s13] ss:$0 sm:$0xff] }
 0x13b   :  { %v1252_v25 = vadd.f32 %v1251_v17, %v1239_v19  ;;  %v3612_v17 = vld [vmem:[%s4335_s3] ss:$0 sm:$0xff] }
 0x13d   :  { %v4258_v27 = vadd.f32 %v3611_v20, %v1252_v25  ;;  %v3513_v25 = vld [vmem:[#allocation17 + $0x10] sm:$0xff] }
 0x13e   :  { %1457 = vmatpush.bf16.msrb.mxu1 %v3480_v12 }
 0x13f   :  { %v2890_v29 = vmul.f32 -1.442695, %v4258_v27 }
 0x140   :  { %v1240_v32 = vpop.f32.mrf.mxu2 }
 0x141   :  { %v1253_v33 = vpop.f32.mrf.mxu3  ;;  %3618 = vpow2.f32 %v2890_v29  ;;  %v3511_v32 = vld [vmem:[#allocation17] sm:$0xff] }
 0x142   :  { %1458 = vmatpush.bf16.msrb.mxu1 %v3479_v13 }
 0x146   :  { %1777 = vmatpush.bf16.msra.mxu1 %v3518_v14 }
 0x147   :  { %v3619_v41 = vpop.eup %3618 }
 0x148   :  { %v1263_v42 = vadd.f32 1.0, %v3619_v41 }
 0x14a   :  { %3620 = vrcp.f32 %v1263_v42  ;;  %v1275_v57 = vand.u32 2147483648, %v1263_v42  ;;  %v1273_v60 = vand.u32 2147483647, %v1263_v42  ;;  %vm1269_vm1 = vweird.f32 %v1263_v42  ;;  %1778 = vmatpush.bf16.msra.mxu1 %v3517_v15 }
 0x14c   :  { %v1276_v1 = vor.u32 1.1754944e-38, %v1275_v57  ;;  %vm1274_vm3 = vcmp.eq.f32.partialorder %v1273_v60, 8.507059e+37  ;;  %v3529_v57 = vld [vmem:[#allocation20 + $0x10] sm:$0xff] }
 0x14e   :  { %1779 = vmatpush.bf16.msra.mxu1 %v3516_v16 }
 0x150   :  { %v3621_v50 = vpop.eup %3620 }
 0x151   :  { %v1265_v52 = vmul.f32 %v3621_v50, %v1263_v42  ;;  %vm1270_vm0 = vweird.f32 %v3621_v50 }
 0x152   :  { %vm1271_vm2 = vmor %vm1269_vm1, %vm1270_vm0  ;;  %1780 = vmatpush.bf16.msra.mxu1 %v3515_v18  ;;  %v3540_v18 = vld [vmem:[#allocation22 + $0x28] sm:$0xff] }
 0x153   :  { %v1266_v56 = vsub.f32 1.0, %v1265_v52 }
 0x155   :  { %v1267_v59 = vmul.f32 %v3621_v50, %v1266_v56 }
 0x156   :  { %1781 = vmatpush.bf16.msra.mxu1 %v3514_v23  ;;  %v3535_v23 = vld [vmem:[#allocation22] sm:$0xff] }
 0x157   :  { %v1268_v0 = vadd.f32 %v3621_v50, %v1267_v59  ;;  %v3528_v59 = vld [vmem:[#allocation20 + $0x8] sm:$0xff] }
 0x159   :  { %v1272_v3 = vsel %vm1271_vm2, %v3621_v50, %v1268_v0  ;;  %v3531_v50 = vld [vmem:[#allocation20 + $0x20] sm:$0xff] }
 0x15a   :  { %v1277_v5 = vsel %vm1274_vm3, %v1276_v1, %v1272_v3  ;;  %1782 = vmatpush.bf16.msra.mxu1 %v3513_v25  ;;  %v3523_v0 = vld [vmem:[#allocation19 + $0x20] sm:$0xff]  ;;  %v3522_v1 = vld [vmem:[#allocation19 + $0x18] sm:$0xff]  ;;  %v3520_v3 = vld [vmem:[#allocation19 + $0x8] sm:$0xff] }
 0x15b   :  { %v1279_v6 = vmul.f32 %v1277_v5, %v4258_v27  ;;  %1863 = vmatpush.bf16.msra.mxu2 %v3523_v0  ;;  %v3542_v5 = vld [vmem:[#allocation22 + $0x38] sm:$0xff] }
 0x15c   :  { %1955 = vmatpush.bf16.msra.mxu3 %v3542_v5  ;;  %v3545_v5 = vld [vmem:[#allocation23 + $0x14] sm:$0xf] }
 0x15d   :  { %v1280_v7 = vpack.c.bf16 %v1279_v6, %v1279_v6  ;;  %v3614_v6 = vld [vmem:[%s4301_s9] ss:$0 sm:$0xff] }
 0x15e   :  { %1783 = vmatpush.bf16.msra.mxu1 %v3512_v28 }
 0x15f   :  { %1357 = vmatmul.bf16.vlgmr.msrb.gmra.mxu0 %v1280_v7  ;;  %1864 = vmatpush.bf16.msra.mxu2 %v3522_v1  ;;  %v3201_v1 = vld [vmem:[#allocation23 + $0x28] sm:$0xf0] }
 0x160   :  { %2016 = vmatpush.bf16.msrb.mxu0 %v3534_v34 }
 0x162   :  { %1784 = vmatpush.bf16.msra.mxu1 %v3511_v32  ;;  %v3558_v32 = vld [vmem:[#allocation23 + $0x74] sm:$0xf0] }
 0x163   :  { %1865 = vmatpush.bf16.msra.mxu2 %v3521_v2 }
 0x164   :  { %2017 = vmatpush.bf16.msrb.mxu0 %v3533_v38  ;;  %v3556_v38 = vld [vmem:[#allocation23 + $0x64] sm:$0xf0] }
 0x167   :  { %1866 = vmatpush.bf16.msra.mxu2 %v3520_v3  ;;  %v3191_v3 = vld [vmem:[#allocation23 + $0x10] sm:$0xf] }
 0x168   :  { %2018 = vmatpush.bf16.msrb.mxu0 %v3532_v45  ;;  %v3553_v45 = vld [vmem:[#allocation23 + $0x54] sm:$0xf] }
 0x16b   :  { %1867 = vmatpush.bf16.msra.mxu2 %v3519_v4  ;;  %v3546_v4 = vld [vmem:[#allocation23 + $0x14] sm:$0xf0] }
 0x16c   :  { %2019 = vmatpush.bf16.msrb.mxu0 %v3531_v50  ;;  %v3552_v50 = vld [vmem:[#allocation23 + $0x44] sm:$0xf0] }
 0x16f   :  { %1702 = vmatmul.bf16.vlgmr.msra.gmra.mxu0 %v1520_v8 }
 0x170   :  { %2020 = vmatpush.bf16.msrb.mxu0 %v3530_v55  ;;  %v3207_v55 = vld [vmem:[#allocation23 + $0x30] sm:$0xf] }
 0x174   :  { %2021 = vmatpush.bf16.msrb.mxu0 %v3529_v57  ;;  %v3549_v57 = vld [vmem:[#allocation23 + $0x34] sm:$0xf] }
 0x178   :  { %2022 = vmatpush.bf16.msrb.mxu0 %v3528_v59  ;;  %v3209_v59 = vld [vmem:[#allocation23 + $0x38] sm:$0xf0] }
 0x17c   :  { %2023 = vmatpush.bf16.msrb.mxu0 %v3527_v63  ;;  %v3547_v63 = vld [vmem:[#allocation23 + $0x24] sm:$0xf] }
 0x17d   :  { %v3204_v2 = vor.u32 %v3547_v63, %v3201_v1  ;;  %v3363_v63 = vld [vmem:[#allocation25 + $0xe8] sm:$0xf0]  ;;  %v3281_v1 = vld [vmem:[#allocation25 + $0x40] sm:$0xf] }
 0x19a   :  { %v1677_v20 = vpop.f32.mrf.mxu2 }
 0x19b   :  { %v1678_v53 = vadd.f32 %v3613_v47, %v1677_v20  ;;  %v3538_v20 = vld [vmem:[#allocation22 + $0x18] sm:$0xff] }
 0x19c   :  { %v3225_v47 = vld [vmem:[#allocation23 + $0x58] sm:$0xf0] }
 0x1a2   :  { %v1679_v27 = vpop.f32.mrf.mxu2 }
 0x1a6   :  { %v1690_v22 = vpop.f32.mrf.mxu3 }
 0x1a7   :  { %v1691_v56 = vadd.f32 %v1690_v22, %v1678_v53  ;;  %v3536_v22 = vld [vmem:[#allocation22 + $0x8] sm:$0xff] }
 0x1a8   :  { %v3217_v53 = vld [vmem:[#allocation23 + $0x48] sm:$0xf0] }
 0x1ae   :  { %v1692_v29 = vpop.f32.mrf.mxu3 }
 0x1dc   :  { %v1358_v19 = vpop.f32.mrf.mxu0 }
 0x1dd   :  { %v1359_v21 = vadd.f32 %v3612_v17, %v1358_v19  ;;  %v3541_v17 = vld [vmem:[#allocation22 + $0x30] sm:$0xff]  ;;  %v3539_v19 = vld [vmem:[#allocation22 + $0x20] sm:$0xff] }
 0x1de   :  { %1956 = vmatpush.bf16.msra.mxu3 %v3541_v17 }
 0x1df   :  { %v2923_v24 = vmul.f32 -1.442695, %v1359_v21 }
 0x1e1   :  { %3622 = vpow2.f32 %v2923_v24 }
 0x1e2   :  { %1957 = vmatpush.bf16.msra.mxu3 %v3540_v18 }
 0x1e4   :  { %v1360_v26 = vpop.f32.mrf.mxu0 }
 0x1e5   :  { %v3616_v26 = vld [vmem:[%s4307_s15] ss:$0 sm:$0xff] }
 0x1e6   :  { %1958 = vmatpush.bf16.msra.mxu3 %v3539_v19 }
 0x1e7   :  { %v3623_v30 = vpop.eup %3622 }
 0x1e8   :  { %v1365_v31 = vadd.f32 1.0, %v3623_v30 }
 0x1ea   :  { %3624 = vrcp.f32 %v1365_v31  ;;  %v1377_v41 = vand.u32 2147483648, %v1365_v31  ;;  %v1375_v44 = vand.u32 2147483647, %v1365_v31  ;;  %vm1371_vm5 = vweird.f32 %v1365_v31  ;;  %1959 = vmatpush.bf16.msra.mxu3 %v3538_v20 }
 0x1ec   :  { %v1703_v33 = vpop.f32.mrf.mxu0  ;;  %v1378_v48 = vor.u32 1.1754944e-38, %v1377_v41  ;;  %vm1376_vm7 = vcmp.eq.f32.partialorder %v1375_v44, 8.507059e+37  ;;  %v3233_v41 = vld [vmem:[#allocation23 + $0x68] sm:$0xf0]  ;;  %v3554_v44 = vld [vmem:[#allocation23 + $0x54] sm:$0xf0] }
 0x1ed   :  { %v1704_v58 = vadd.f32 %v1703_v33, %v1691_v56  ;;  %v3557_v33 = vld [vmem:[#allocation23 + $0x74] sm:$0xf]  ;;  %v3550_v56 = vld [vmem:[#allocation23 + $0x34] sm:$0xf0] }
 0x1ef   :  { %v1707_v60 = vmax.f32 %v1704_v58, 0.0  ;;  %v3208_v58 = vor.u32 %v3550_v56, %v3207_v55  ;;  %v3569_v55 = vld [vmem:[#allocation25 + $0x54] sm:$0xf] }
 0x1f0   :  { %v3625_v35 = vpop.eup %3624 }
 0x1f1   :  { %v1367_v37 = vmul.f32 %v3625_v35, %v1365_v31  ;;  %vm1372_vm4 = vweird.f32 %v3625_v35  ;;  %v1708_v61 = vpack.c.bf16 %v1707_v60, %v1707_v60  ;;  %v3239_v31 = vld [vmem:[#allocation23 + $0x70] sm:$0xf]  ;;  %v3212_v60 = vor.u32 %v3549_v57, %v3209_v59  ;;  %v3291_v57 = vld [vmem:[#allocation25 + $0x58] sm:$0xf0]  ;;  %v3361_v59 = vld [vmem:[#allocation25 + $0xe0] sm:$0xf] }
 0x1f2   :  { %vm1373_vm6 = vmor %vm1371_vm5, %vm1372_vm4  ;;  %v3240_v34 = vor.u32 %v3558_v32, %v3239_v31  ;;  %vm2478_vm4 = vcmask 1041408  }
 0x1f3   :  { %v1368_v40 = vsub.f32 1.0, %v1367_v37  ;;  %v3231_v37 = vld [vmem:[#allocation23 + $0x60] sm:$0xf] }
 0x1f4   :  { %v1705_v42 = vpop.f32.mrf.mxu0 }
 0x1f5   :  { %v1369_v43 = vmul.f32 %v3625_v35, %v1368_v40  ;;  %v3232_v40 = vor.u32 %v3556_v38, %v3231_v37  ;;  %v3236_v42 = vor.u32 %v3555_v39, %v3233_v41  ;;  %v3573_v37 = vld [vmem:[#allocation25 + $0x74] sm:$0xf]  ;;  %v3307_v39 = vld [vmem:[#allocation25 + $0x78] sm:$0xf0]  ;;  %v3297_v41 = vld [vmem:[#allocation25 + $0x60] sm:$0xf] }
 0x1f7   :  { %v1370_v46 = vadd.f32 %v3625_v35, %v1369_v43  ;;  %v3223_v43 = vld [vmem:[#allocation23 + $0x50] sm:$0xf] }
 0x1f9   :  { %v1374_v49 = vsel %vm1373_vm6, %v3625_v35, %v1370_v46  ;;  %v3241_v35 = vld [vmem:[#allocation23 + $0x78] sm:$0xf0]  ;;  %v3224_v46 = vor.u32 %v3554_v44, %v3223_v43  ;;  %v3571_v44 = vld [vmem:[#allocation25 + $0x64] sm:$0xf] }
 0x1fa   :  { %v1379_v51 = vsel %vm1376_vm7, %v1378_v48, %v1374_v49  ;;  %v3244_v36 = vor.u32 %v3557_v33, %v3241_v35  ;;  %v3228_v48 = vor.u32 %v3553_v45, %v3225_v47  ;;  %v3215_v49 = vld [vmem:[#allocation23 + $0x40] sm:$0xf]  ;;  %v3305_v35 = vld [vmem:[#allocation25 + $0x70] sm:$0xf]  ;;  %v3299_v45 = vld [vmem:[#allocation25 + $0x68] sm:$0xf0] }
 0x1fb   :  { %v1381_v52 = vmul.f32 %v1379_v51, %v1359_v21  ;;  %v3537_v21 = vld [vmem:[#allocation22 + $0x10] sm:$0xff]  ;;  %v3551_v51 = vld [vmem:[#allocation23 + $0x44] sm:$0xf] }
 0x1fc   :  { %1960 = vmatpush.bf16.msra.mxu3 %v3537_v21  ;;  %2170 = vmatpush.bf16.msrb.mxu2 %v3244_v36  ;;  %v3574_v36 = vld [vmem:[#allocation25 + $0x74] sm:$0xf0]  ;;  %v3369_v47 = vld [vmem:[#allocation25 + $0xf0] sm:$0xf] }
 0x1fd   :  { %v1382_v54 = vpack.c.bf16 %v1381_v52, %v1381_v52  ;;  %v3216_v52 = vor.u32 %v3552_v50, %v3215_v49  ;;  %v3306_v38 = vor.u32 %v3574_v36, %v3305_v35  ;;  %v3589_v49 = vld [vmem:[#allocation25 + $0xf4] sm:$0xf]  ;;  %v3339_v36 = vld [vmem:[#allocation25 + $0xb8] sm:$0xf0] }
 0x1ff   :  { %1459 = vmatmul.bf16.vlgmr.msrb.gmra.mxu1 %v1382_v54  ;;  %v3220_v54 = vor.u32 %v3551_v51, %v3217_v53  ;;  %v3371_v51 = vld [vmem:[#allocation25 + $0xf8] sm:$0xf0]  ;;  %v3289_v53 = vld [vmem:[#allocation25 + $0x50] sm:$0xf] }
 0x200   :  { %1961 = vmatpush.bf16.msra.mxu3 %v3536_v22  ;;  %2157 = vmatpush.bf16.msrb.mxu1 %v3240_v34 }
 0x201   :  { %2171 = vmatpush.bf16.msrb.mxu2 %v3236_v42  ;;  %v3572_v42 = vld [vmem:[#allocation25 + $0x64] sm:$0xf0] }
 0x202   :  { %v3298_v43 = vor.u32 %v3572_v42, %v3297_v41  ;;  %v3259_v42 = vld [vmem:[#allocation25 + $0x18] sm:$0xf0] }
 0x204   :  { %1962 = vmatpush.bf16.msra.mxu3 %v3535_v23  ;;  %2158 = vmatpush.bf16.msrb.mxu1 %v3232_v40  ;;  %v3310_v40 = vor.u32 %v3573_v37, %v3307_v39  ;;  %v3562_v39 = vld [vmem:[#allocation25 + $0x14] sm:$0xf0] }
 0x205   :  { %2172 = vmatpush.bf16.msrb.mxu2 %v3228_v48  ;;  %v3590_v48 = vld [vmem:[#allocation25 + $0xf4] sm:$0xf0] }
 0x206   :  { %v3370_v50 = vor.u32 %v3590_v48, %v3369_v47 }
 0x208   :  { %2159 = vmatpush.bf16.msrb.mxu1 %v3224_v46  ;;  %2423 = vmatpush.bf16.msrb.mxu3 %v3306_v38  ;;  %v3302_v46 = vor.u32 %v3571_v44, %v3299_v45  ;;  %v3257_v38 = vld [vmem:[#allocation25 + $0x10] sm:$0xf]  ;;  %v3329_v44 = vld [vmem:[#allocation25 + $0xa0] sm:$0xf]  ;;  %v3580_v45 = vld [vmem:[#allocation25 + $0xa4] sm:$0xf0] }
 0x209   :  { %2173 = vmatpush.bf16.msrb.mxu2 %v3220_v54  ;;  %v3570_v54 = vld [vmem:[#allocation25 + $0x54] sm:$0xf0]  ;;  %2436 = vmatpush.bf16.msra.mxu0 %v3370_v50  ;;  %v3258_v41 = vor.u32 %v3562_v39, %v3257_v38  ;;  %v3330_v48 = vor.u32 %v3580_v45, %v3329_v44 }
 0x20a   :  { %v3290_v56 = vor.u32 %v3570_v54, %v3289_v53  ;;  %v3559_v53 = vld [vmem:[#allocation25 + $0x4] sm:$0xf] }
 0x20c   :  { %2160 = vmatpush.bf16.msrb.mxu1 %v3216_v52  ;;  %2424 = vmatpush.bf16.msrb.mxu3 %v3298_v43  ;;  %v3374_v52 = vor.u32 %v3589_v49, %v3371_v51  ;;  %v3331_v49 = vld [vmem:[#allocation25 + $0xa8] sm:$0xf0]  ;;  %v3249_v51 = vld [vmem:[#allocation25] sm:$0xf] }
 0x20d   :  { %2174 = vmatpush.bf16.msrb.mxu2 %v3212_v60  ;;  %v3588_v60 = vld [vmem:[#allocation25 + $0xe4] sm:$0xf0] }
 0x20f   :  { %1785 = vmatmul.bf16.vlgmr.msra.gmra.mxu1 %v1708_v61  ;;  %v3199_v61 = vld [vmem:[#allocation23 + $0x20] sm:$0xf] }
 0x210   :  { %2161 = vmatpush.bf16.msrb.mxu1 %v3208_v58  ;;  %v3200_v0 = vor.u32 %v3548_v62, %v3199_v61  ;;  %v3294_v58 = vor.u32 %v3569_v55, %v3291_v57  ;;  %v3587_v61 = vld [vmem:[#allocation25 + $0xe4] sm:$0xf]  ;;  %2425 = vmatpush.bf16.msrb.mxu3 %v3290_v56  ;;  %v3362_v62 = vor.u32 %v3588_v60, %v3361_v59  ;;  %v3251_v55 = vld [vmem:[#allocation25 + $0x8] sm:$0xf0]  ;;  %v3321_v57 = vld [vmem:[#allocation25 + $0x90] sm:$0xf] }
 0x211   :  { %2175 = vmatpush.bf16.msrb.mxu2 %v3204_v2  ;;  %v3568_v2 = vld [vmem:[#allocation25 + $0x44] sm:$0xf0]  ;;  %v3254_v56 = vor.u32 %v3559_v53, %v3251_v55  ;;  %v3577_v59 = vld [vmem:[#allocation25 + $0x94] sm:$0xf] }
 0x212   :  { %2437 = vmatpush.bf16.msra.mxu0 %v3362_v62  ;;  %v3323_v62 = vld [vmem:[#allocation25 + $0x98] sm:$0xf0] }
 0x214   :  { %2162 = vmatpush.bf16.msrb.mxu1 %v3200_v0  ;;  %v3366_v0 = vor.u32 %v3587_v61, %v3363_v63 }
 0x27c   :  { %v1460_v7 = vpop.f32.mrf.mxu1 }
 0x27d   :  { %v1461_v8 = vadd.f32 %v3614_v6, %v1460_v7  ;;  %v3192_v6 = vor.u32 %v3546_v4, %v3191_v3  ;;  %v3193_v7 = vld [vmem:[#allocation23 + $0x18] sm:$0xf0]  ;;  %v3567_v3 = vld [vmem:[#allocation25 + $0x44] sm:$0xf]  ;;  %v3282_v4 = vor.u32 %v3568_v2, %v3281_v1 }
 0x27f   :  { %v1873_v9 = vpack.c.bf16 %v1461_v8, %v1461_v8  ;;  %v3196_v8 = vor.u32 %v3545_v5, %v3193_v7  ;;  %2163 = vmatpush.bf16.msrb.mxu1 %v3192_v6  ;;  %v3283_v5 = vld [vmem:[#allocation25 + $0x48] sm:$0xf0]  ;;  %v3353_v7 = vld [vmem:[#allocation25 + $0xd0] sm:$0xf]  ;;  %2426 = vmatpush.bf16.msrb.mxu3 %v3282_v4  ;;  %v3576_v4 = vld [vmem:[#allocation25 + $0x84] sm:$0xf0] }
 0x280   :  { %v3286_v6 = vor.u32 %v3567_v3, %v3283_v5  ;;  %v3313_v3 = vld [vmem:[#allocation25 + $0x80] sm:$0xf] }
 0x281   :  { %2024 = vmatmul.bf16.vlgmr.msrb.gmra.mxu0 %v1873_v9  ;;  %v3617_v9 = vld [vmem:[%s4310_s18] ss:$0 sm:$0xff]  ;;  %2176 = vmatpush.bf16.msrb.mxu2 %v3196_v8  ;;  %v3586_v8 = vld [vmem:[#allocation25 + $0xd4] sm:$0xf0]  ;;  %v3314_v5 = vor.u32 %v3576_v4, %v3313_v3 }
 0x284   :  { %v1462_v10 = vpop.f32.mrf.mxu1 }
 0x285   :  { %v3183_v10 = vld [vmem:[#allocation23] sm:$0xf] }
 0x28c   :  { %v1786_v12 = vpop.f32.mrf.mxu1 }
 0x28d   :  { %v1787_v13 = vadd.f32 %v3615_v11, %v1786_v12  ;;  %v3544_v11 = vld [vmem:[#allocation23 + $0x4] sm:$0xf0]  ;;  %v3543_v12 = vld [vmem:[#allocation23 + $0x4] sm:$0xf] }
 0x28f   :  { %v1790_v14 = vmax.f32 %v1787_v13, 0.0 }
 0x291   :  { %v1791_v15 = vpack.c.bf16 %v1790_v14, %v1790_v14  ;;  %v3184_v14 = vor.u32 %v3544_v11, %v3183_v10  ;;  %v3354_v10 = vor.u32 %v3586_v8, %v3353_v7  ;;  %v3355_v11 = vld [vmem:[#allocation25 + $0xd8] sm:$0xf0]  ;;  %v3315_v7 = vld [vmem:[#allocation25 + $0x88] sm:$0xf0] }
 0x293   :  { %1868 = vmatmul.bf16.vlgmr.msra.gmra.mxu2 %v1791_v15  ;;  %v3185_v15 = vld [vmem:[#allocation23 + $0x8] sm:$0xf0]  ;;  %2164 = vmatpush.bf16.msrb.mxu1 %v3184_v14  ;;  %v3566_v14 = vld [vmem:[#allocation25 + $0x34] sm:$0xf0] }
 0x294   :  { %v1788_v16 = vpop.f32.mrf.mxu1  ;;  %v3188_v17 = vor.u32 %v3543_v12, %v3185_v15  ;;  %v3565_v15 = vld [vmem:[#allocation25 + $0x34] sm:$0xf]  ;;  %2438 = vmatpush.bf16.msra.mxu0 %v3354_v10 }
 0x296   :  { %2177 = vmatpush.bf16.msrb.mxu2 %v3188_v17  ;;  %v3275_v17 = vld [vmem:[#allocation25 + $0x38] sm:$0xf0] }
 0x297   :  { %2449 = vmatpush.bf16.msra.mxu1 %v3310_v40  ;;  %v3561_v40 = vld [vmem:[#allocation25 + $0x14] sm:$0xf] }
 0x298   :  { %v3262_v43 = vor.u32 %v3561_v40, %v3259_v42 }
 0x29a   :  { %2462 = vmatpush.bf16.msra.mxu2 %v3374_v52  ;;  %v3560_v52 = vld [vmem:[#allocation25 + $0x4] sm:$0xf0] }
 0x29b   :  { %2450 = vmatpush.bf16.msra.mxu1 %v3302_v46  ;;  %v3579_v46 = vld [vmem:[#allocation25 + $0xa4] sm:$0xf]  ;;  %v3250_v54 = vor.u32 %v3560_v52, %v3249_v51 }
 0x29c   :  { %v3334_v50 = vor.u32 %v3579_v46, %v3331_v49 }
 0x29e   :  { %2463 = vmatpush.bf16.msra.mxu2 %v3366_v0  ;;  %v3326_v0 = vor.u32 %v3577_v59, %v3323_v62 }
 0x29f   :  { %2451 = vmatpush.bf16.msra.mxu1 %v3294_v58  ;;  %v3578_v58 = vld [vmem:[#allocation25 + $0x94] sm:$0xf0] }
 0x2a0   :  { %v3322_v61 = vor.u32 %v3578_v58, %v3321_v57 }
 0x2a3   :  { %2452 = vmatpush.bf16.msra.mxu1 %v3286_v6  ;;  %v3575_v6 = vld [vmem:[#allocation25 + $0x84] sm:$0xf] }
 0x2a4   :  { %v3318_v8 = vor.u32 %v3575_v6, %v3315_v7 }
 0x2fe   :  { %v4274_v24 = vpop.f32.mrf.mxu0 }
 0x306   :  { %v2027_v25 = vpop.f32.mrf.mxu0 }
 0x316   :  { %v1869_v27 = vpop.f32.mrf.mxu2 }
 0x317   :  { %v1870_v28 = vadd.f32 %v3616_v26, %v1869_v27 }
 0x319   :  { %v1890_v29 = vpack.c.bf16 %v1870_v28, %v1870_v28 }
 0x31b   :  { %1963 = vmatmul.bf16.vlgmr.msra.gmra.mxu3 %v1890_v29 }
 0x31e   :  { %v1871_v30 = vpop.f32.mrf.mxu2 }
 0x39e   :  { %v1964_v13 = vpop.f32.mrf.mxu3 }
 0x39f   :  { %v2026_v16 = vadd.f32 %v4274_v24, %v1964_v13  ;;  %v3273_v13 = vld [vmem:[#allocation25 + $0x30] sm:$0xf] }
 0x3a1   :  { %v2033_v18 = vadd.f32 %v3617_v9, %v2026_v16  ;;  %v3585_v9 = vld [vmem:[#allocation25 + $0xd4] sm:$0xf]  ;;  %v3274_v16 = vor.u32 %v3566_v14, %v3273_v13 }
 0x3a2   :  { %v3358_v12 = vor.u32 %v3585_v9, %v3355_v11 }
 0x3a3   :  { %v3180_v19 = vmul.f32 -1.442695, %v2033_v18  ;;  %2427 = vmatpush.bf16.msrb.mxu3 %v3274_v16 }
 0x3a4   :  { %2464 = vmatpush.bf16.msra.mxu2 %v3358_v12 }
 0x3a5   :  { %3626 = vpow2.f32 %v3180_v19  ;;  %v3345_v19 = vld [vmem:[#allocation25 + $0xc0] sm:$0xf] }
 0x3a6   :  { %v1966_v20 = vpop.f32.mrf.mxu3 }
 0x3a7   :  { %v3584_v20 = vld [vmem:[#allocation25 + $0xc4] sm:$0xf0] }
 0x3ab   :  { %v3627_v21 = vpop.eup %3626 }
 0x3ac   :  { %v2037_v22 = vadd.f32 1.0, %v3627_v21  ;;  %v3583_v21 = vld [vmem:[#allocation25 + $0xc4] sm:$0xf] }
 0x3ae   :  { %3628 = vrcp.f32 %v2037_v22  ;;  %v2049_v27 = vand.u32 2147483648, %v2037_v22  ;;  %v2047_v29 = vand.u32 2147483647, %v2037_v22  ;;  %vm2043_vm9 = vweird.f32 %v2037_v22 }
 0x3b0   :  { %v2050_v24 = vor.u32 1.1754944e-38, %v2049_v27  ;;  %vm2048_vm11 = vcmp.eq.f32.partialorder %v2047_v29, 8.507059e+37  ;;  %v3564_v27 = vld [vmem:[#allocation25 + $0x24] sm:$0xf0] }
 0x3b4   :  { %v3629_v23 = vpop.eup %3628 }
 0x3b5   :  { %v2039_v25 = vmul.f32 %v3629_v23, %v2037_v22  ;;  %vm2044_vm8 = vweird.f32 %v3629_v23  ;;  %v3346_v22 = vor.u32 %v3584_v20, %v3345_v19 }
 0x3b6   :  { %vm2045_vm10 = vmor %vm2043_vm9, %vm2044_vm8 }
 0x3b7   :  { %v2040_v26 = vsub.f32 1.0, %v2039_v25  ;;  %2439 = vmatpush.bf16.msra.mxu0 %v3346_v22 }
 0x3b9   :  { %v2041_v28 = vmul.f32 %v3629_v23, %v2040_v26  ;;  %v3265_v26 = vld [vmem:[#allocation25 + $0x20] sm:$0xf] }
 0x3ba   :  { %v3266_v29 = vor.u32 %v3564_v27, %v3265_v26 }
 0x3bb   :  { %v2042_v30 = vadd.f32 %v3629_v23, %v2041_v28  ;;  %v3563_v28 = vld [vmem:[#allocation25 + $0x24] sm:$0xf] }
 0x3bc   :  { %2428 = vmatpush.bf16.msrb.mxu3 %v3266_v29 }
 0x3bd   :  { %v2046_v31 = vsel %vm2045_vm10, %v3629_v23, %v2042_v30  ;;  %v3347_v23 = vld [vmem:[#allocation25 + $0xc8] sm:$0xf0] }
 0x3be   :  { %v2051_v32 = vsel %vm2048_vm11, %v2050_v24, %v2046_v31  ;;  %v3350_v25 = vor.u32 %v3583_v21, %v3347_v23  ;;  %v3267_v30 = vld [vmem:[#allocation25 + $0x28] sm:$0xf0]  ;;  %v3337_v31 = vld [vmem:[#allocation25 + $0xb0] sm:$0xf] }
 0x3bf   :  { %v2053_v33 = vmul.f32 %v2051_v32, %v2033_v18  ;;  %v3278_v18 = vor.u32 %v3565_v15, %v3275_v17  ;;  %v3270_v24 = vor.u32 %v3563_v28, %v3267_v30  ;;  %v3582_v32 = vld [vmem:[#allocation25 + $0xb4] sm:$0xf0] }
 0x3c0   :  { %2465 = vmatpush.bf16.msra.mxu2 %v3350_v25  ;;  %v3338_v35 = vor.u32 %v3582_v32, %v3337_v31  ;;  %2429 = vmatpush.bf16.msrb.mxu3 %v3258_v41 }
 0x3c1   :  { %v2054_v34 = vpack.c.bf16 %v2053_v33, %v2053_v33  ;;  %2453 = vmatpush.bf16.msra.mxu1 %v3278_v18  ;;  %v3581_v33 = vld [vmem:[#allocation25 + $0xb4] sm:$0xf] }
 0x3c2   :  { %v3342_v37 = vor.u32 %v3581_v33, %v3339_v36  ;;  %2440 = vmatpush.bf16.msra.mxu0 %v3338_v35 }
 0x3c3   :  { %2165 = vmatmul.bf16.vlgmr.msrb.gmra.mxu1 %v2054_v34  ;;  %2178 = vmatmul.bf16.vlgmr.msrb.gmra.mxu2 %v2054_v34  ;;  %v2071_v34 = vld [vmem:[%s4312_s20] sm:$0x3] }
 0x3c4   :  { %2466 = vmatpush.bf16.msra.mxu2 %v3342_v37  ;;  %v2073_v47 = vperm.slane %v2071_v34, 0  ;;  %2430 = vmatpush.bf16.msrb.mxu3 %v3250_v54  ;;  %v2074_v1 = vperm.slane %v2071_v34, 1 }
 0x3c5   :  { %2454 = vmatpush.bf16.msra.mxu1 %v3270_v24 }
 0x3c6   :  { %2441 = vmatpush.bf16.msra.mxu0 %v3330_v48 }
 0x3c8   :  { %2467 = vmatpush.bf16.msra.mxu2 %v3334_v50 }
 0x3c9   :  { %2455 = vmatpush.bf16.msra.mxu1 %v3262_v43  ;;  %v2257_v43 = vld [vmem:[%s4336_s16] sm:$0x3] }
 0x3ca   :  { %2442 = vmatpush.bf16.msra.mxu0 %v3322_v61  ;;  %v2260_v46 = vperm.slane %v2257_v43, 1 }
 0x3cc   :  { %2468 = vmatpush.bf16.msra.mxu2 %v3326_v0 }
 0x3cd   :  { %2456 = vmatpush.bf16.msra.mxu1 %v3254_v56 }
 0x3ce   :  { %2443 = vmatpush.bf16.msra.mxu0 %v3314_v5 }
 0x3d0   :  { %2469 = vmatpush.bf16.msra.mxu2 %v3318_v8 }
 0x440   :  { %v2166_v60 = vpop.f32.mrf.mxu1 }
 0x441   :  { %v2167_v63 = vadd.f32 %v2166_v60, %v2073_v47  ;;  %v2259_v47 = vperm.slane %v2257_v43, 0 }
 0x443   :  { %v3245_v2 = vmul.f32 -1.442695, %v2167_v63 }
 0x445   :  { %3630 = vpow2.f32 %v3245_v2 }
 0x446   :  { %v2179_v9 = vpop.f32.mrf.mxu2 }
 0x447   :  { %v2180_v10 = vadd.f32 %v2179_v9, %v2074_v1 }
 0x448   :  { %v2168_v11 = vpop.f32.mrf.mxu1 }
 0x449   :  { %v3246_v12 = vmul.f32 -1.442695, %v2180_v10 }
 0x44b   :  { %v3631_v13 = vpop.eup %3630  ;;  %3632 = vpow2.f32 %v3246_v12 }
 0x44c   :  { %v2189_v14 = vadd.f32 1.0, %v3631_v13 }
 0x44e   :  { %3634 = vrcp.f32 %v2189_v14  ;;  %v2181_v15 = vpop.f32.mrf.mxu2  ;;  %v2202_v21 = vand.u32 2147483648, %v2189_v14  ;;  %v2200_v23 = vand.u32 2147483647, %v2189_v14  ;;  %vm2196_vm13 = vweird.f32 %v2189_v14 }
 0x450   :  { %v2203_v28 = vor.u32 1.1754944e-38, %v2202_v21  ;;  %vm2201_vm15 = vcmp.eq.f32.partialorder %v2200_v23, 8.507059e+37 }
 0x451   :  { %v3633_v16 = vpop.eup %3632 }
 0x452   :  { %v2190_v17 = vadd.f32 1.0, %v3633_v16 }
 0x454   :  { %v3635_v18 = vpop.eup %3634  ;;  %3636 = vrcp.f32 %v2190_v17  ;;  %v2217_v31 = vand.u32 2147483648, %v2190_v17  ;;  %v2215_v34 = vand.u32 2147483647, %v2190_v17  ;;  %vm2211_vm1 = vweird.f32 %v2190_v17 }
 0x455   :  { %v2192_v19 = vmul.f32 %v3635_v18, %v2189_v14  ;;  %vm2197_vm12 = vweird.f32 %v3635_v18 }
 0x456   :  { %vm2198_vm14 = vmor %vm2196_vm13, %vm2197_vm12  ;;  %v2218_v37 = vor.u32 1.1754944e-38, %v2217_v31  ;;  %vm2216_vm3 = vcmp.eq.f32.partialorder %v2215_v34, 8.507059e+37 }
 0x457   :  { %v2193_v20 = vsub.f32 1.0, %v2192_v19 }
 0x459   :  { %v2194_v22 = vmul.f32 %v3635_v18, %v2193_v20 }
 0x45a   :  { %v3637_v25 = vpop.eup %3636 }
 0x45b   :  { %v2195_v26 = vadd.f32 %v3635_v18, %v2194_v22  ;;  %v2207_v27 = vmul.f32 %v3637_v25, %v2190_v17  ;;  %vm2212_vm0 = vweird.f32 %v3637_v25 }
 0x45c   :  { %vm2213_vm2 = vmor %vm2211_vm1, %vm2212_vm0 }
 0x45d   :  { %v2199_v29 = vsel %vm2198_vm14, %v3635_v18, %v2195_v26  ;;  %v2208_v30 = vsub.f32 1.0, %v2207_v27 }
 0x45e   :  { %v2204_v24 = vsel %vm2201_vm15, %v2203_v28, %v2199_v29 }
 0x45f   :  { %v2221_v32 = vmul.f32 %v2204_v24, %v2167_v63  ;;  %v2209_v33 = vmul.f32 %v3637_v25, %v2208_v30 }
 0x461   :  { %v2223_v35 = vpack.c.bf16 %v2221_v32, %v2221_v32  ;;  %v2210_v36 = vadd.f32 %v3637_v25, %v2209_v33 }
 0x463   :  { %v2214_v38 = vsel %vm2213_vm2, %v3637_v25, %v2210_v36  ;;  %2431 = vmatmul.bf16.vlgmr.msrb.gmra.mxu3 %v2223_v35  ;;  %2457 = vmatmul.bf16.vlgmr.msra.gmra.mxu1 %v2223_v35 }
 0x464   :  { %v2219_v39 = vsel %vm2216_vm3, %v2218_v37, %v2214_v38 }
 0x465   :  { %v2222_v40 = vmul.f32 %v2219_v39, %v2180_v10 }
 0x467   :  { %v2224_v41 = vpack.c.bf16 %v2222_v40, %v2222_v40 }
 0x469   :  { %2444 = vmatmul.bf16.vlgmr.msra.gmra.mxu0 %v2224_v41  ;;  %2470 = vmatmul.bf16.vlgmr.msra.gmra.mxu2 %v2224_v41 }
 0x4e0   :  { %v2458_v42 = vpop.f32.mrf.mxu1 }
 0x4e1   :  { %v2459_v49 = vadd.f32 %v2458_v42, %v2260_v46 }
 0x4e6   :  { %v2432_v44 = vpop.f32.mrf.mxu3  ;;  %v2445_v45 = vpop.f32.mrf.mxu0 }
 0x4e7   :  { %v2433_v50 = vadd.f32 %v2432_v44, %v2259_v47 }
 0x4e8   :  { %v2460_v48 = vpop.f32.mrf.mxu1 }
 0x4e9   :  { %v2446_v55 = vadd.f32 %v2445_v45, %v2433_v50 }
 0x4ec   :  { %v2471_v51 = vpop.f32.mrf.mxu2 }
 0x4ed   :  { %v2472_v52 = vadd.f32 %v2471_v51, %v2459_v49 }
 0x4ee   :  { %v2434_v53 = vpop.f32.mrf.mxu3  ;;  %v2447_v54 = vpop.f32.mrf.mxu0 }
 0x4ef   :  { %v2477_v56 = vrot.slane %v2472_v52, 6 }
 0x4f1   :  { %v2479_v57 = vsel %vm2478_vm4, %v2446_v55, %v2477_v56 }
 0x4f2   :  { %2481 = vst [vmem:[#allocation26] sm:$0xf] %v2479_v57 }
 0x4f3   :  { %2492 = dma.vmem_to_hbm [thread:$0]  %s2488_s24, 64, %s2490_s7, [#allocation4]  }
 0x4f4   :  { %v2473_v58 = vpop.f32.mrf.mxu2 }
 0x4f5   :  { %4038 = dma.done.wait [#allocation4], 64  }
 0x4f6   :  { %4039 = vsyncadd [#allocation4], 4294967232 }
 0x4f7   :  { %2497 = vsyncpa [#allocation3], 1 }
 0x4f8   :  { %2498 = vsyncpa [#allocation6], 1 }
 0x4f9   :  { %2499 = vsyncpa [#allocation9], 1 }
 0x4fa   :  { %2500 = vsyncpa [#allocation12], 1 }
 0x4fb   :  { %2501 = vsyncpa [#allocation15], 1 }
 0x4fc   :  { %2502 = vsyncpa [#allocation18], 1 }
 0x4fd   :  { %2503 = vsyncpa [#allocation21], 1 }
 0x4fe   :  { %2504 = vsyncpa [#allocation24], 1 }
 0x4ff   :  { %2505 = vsyncpa [#allocation4], 1 }

</bundles_post_ra>
